<compile_context>
chip_gen: v7x
topology: tpu7x:2x2x1
jax: 0.10.0
libtpu: 0.0.40
codegen_flags: <defaults>
</compile_context>

<pallas_src>
import numpy as np
import jax
import jax.numpy as jnp
from jax import lax
from jax.experimental import pallas as pl
from jax.experimental.pallas import tpu as pltpu


# ---------------------------------------------------------------------------
# Separable zero-padded all-ones box filter over the last two dims of z.
# Exactly equivalent to F.conv2d(z, ones(2r+1, 2r+1), padding=r).
# ---------------------------------------------------------------------------
def _box(z, r):
    H, W = z.shape[-2], z.shape[-1]
    lead = z.shape[:-2]
    # rows (sublane direction)
    zr = jnp.zeros(lead + (r, W), z.dtype)
    zp = jnp.concatenate([zr, z, zr], axis=-2)          # (..., H+2r, W)
    acc = zp[..., 0:H, :]
    for d in range(1, 2 * r + 1):
        acc = acc + zp[..., d:d + H, :]
    # cols (lane direction)
    zc = jnp.zeros(lead + (H, r), z.dtype)
    ap = jnp.concatenate([zc, acc, zc], axis=-1)        # (..., H, W+2r)
    out = ap[..., :, 0:W]
    for d in range(1, 2 * r + 1):
        out = out + ap[..., :, d:d + W]
    return out


# ---------------------------------------------------------------------------
# Pallas kernel: per-image partial reductions.
#   out lanes: [bce_pos_sum, bce_neg_sum, num_pos, num_neg, tex_loss, bdr_loss, 0, 0]
# ---------------------------------------------------------------------------
def _rcf_partials_kernel(pred_ref, targ_ref, out_ref):
    x = pred_ref[0]   # (H, W) float32 predictions in (0, 1)
    t = targ_ref[0]   # (H, W) float32 labels in {0, 1, 2}

    # ---------------- weighted BCE partial sums (per class) -----------------
    log_p = jnp.maximum(jnp.log(x), -100.0)        # PyTorch BCE clamps log at -100
    log_1mp = jnp.maximum(jnp.log(1.0 - x), -100.0)
    is_pos = (t == 1.0)
    is_neg = (t == 0.0)
    s_pos = jnp.sum(jnp.where(is_pos, -log_p, 0.0), keepdims=True)     # (1, 1)
    s_neg = jnp.sum(jnp.where(is_neg, -log_1mp, 0.0), keepdims=True)
    n_pos = jnp.sum(is_pos.astype(jnp.float32), keepdims=True)
    n_neg = jnp.sum(is_neg.astype(jnp.float32), keepdims=True)

    label_w = (t != 0.0).astype(jnp.float32)

    # fused 9x9 boxes of label_w and x*label_w (stacked along a leading axis)
    stacked = jnp.concatenate([label_w[None], (x * label_w)[None]], axis=0)
    boxed9 = _box(stacked, 4)                      # (2, H, W)
    label_sums9 = boxed9[0]                        # == texture_mask (exact ints)
    pred_bdr_sum = label_w * boxed9[1]

    # ------------------------------ textureloss -----------------------------
    pred_sums = _box(x, 1)                         # 3x3 box of predictions
    t_loss = -jnp.log(jnp.clip(1.0 - pred_sums / 9.0, 1e-10, 1.0 - 1e-10))
    tex = jnp.sum(jnp.where(label_sums9 > 0.0, 0.0, t_loss), keepdims=True)

    # -------------------------------- bdrloss --------------------------------
    # bmask is already 0 where label_w == 1, so (1 - label_w) * bmask == bmask.
    bmask = jnp.where(label_w == 1.0, 0.0,
                      (label_sums9 != 0.0).astype(jnp.float32))
    pred_texture_sum = _box(x * bmask, 4)
    softmax_map = jnp.clip(
        pred_bdr_sum / (pred_texture_sum + pred_bdr_sum + 1e-10),
        1e-10, 1.0 - 1e-10)
    # -label_w * log(...) is already exactly 0 where label_w == 0 (log finite).
    bdr = jnp.sum(-label_w * jnp.log(softmax_map), keepdims=True)

    # ---------------- pack the 6 scalars into the (1, 8) lane ----------------
    zero = jnp.zeros((1, 1), jnp.float32)
    out_ref[0] = jnp.concatenate(
        [s_pos, s_neg, n_pos, n_neg, tex, bdr, zero, zero], axis=1)


def rcf_loss(inputs, targets, l_weight=(0.0, 0.0)):
    """Pallas implementation of RCFLoss.forward (NCHW inputs, C == 1)."""
    tex_factor, bdr_factor = l_weight
    B, C, H, W = inputs.shape
    N = B * C
    pred = inputs.reshape(N, H, W).astype(jnp.float32)
    targ = targets.reshape(N, H, W).astype(jnp.float32)

    partials = pl.pallas_call(
        _rcf_partials_kernel,
        out_shape=jax.ShapeDtypeStruct((N, 1, 8), jnp.float32),
        grid=(N,),
        in_specs=[
            pl.BlockSpec((1, H, W), lambda n: (n, 0, 0)),
            pl.BlockSpec((1, H, W), lambda n: (n, 0, 0)),
        ],
        out_specs=pl.BlockSpec((1, 1, 8), lambda n: (n, 0, 0)),
        compiler_params=pltpu.CompilerParams(
            dimension_semantics=("parallel",)),
    )(pred, targ)

    # final tiny reduction in the wrapper (keeps the grid axis parallel)
    p = jnp.sum(partials.reshape(N, 8), axis=0)
    s_pos, s_neg, n_pos, n_neg, tex, bdr = p[0], p[1], p[2], p[3], p[4], p[5]

    total = n_pos + n_neg
    # weight(label==1) = num_neg/total, weight(label==0) = 1.1*num_pos/total,
    # weight(label==2) = 0
    cost = (n_neg / total) * s_pos + (1.1 * n_pos / total) * s_neg
    return cost + bdr_factor * bdr + tex_factor * tex


# ---------------------------------------------------------------------------
# Pure-numpy reference (mirrors the PyTorch module) for a correctness check.
# ---------------------------------------------------------------------------
def _np_box(x, r):
    H, W = x.shape
    xp = np.pad(x, r)
    out = np.zeros_like(x)
    for di in range(2 * r + 1):
        for dj in range(2 * r + 1):
            out += xp[di:di + H, dj:dj + W]
    return out


def _ref_rcf_loss(inputs, targets, l_weight):
    tex_factor, bdr_factor = l_weight
    pred = np.asarray(inputs, np.float64)
    label = np.asarray(targets, np.float64)
    num_pos = float((label == 1.0).sum())
    num_neg = float((label == 0.0).sum())
    mask = label.copy()
    mask[label == 1.0] = 1.0 * num_neg / (num_pos + num_neg)
    mask[label == 0.0] = 1.1 * num_pos / (num_pos + num_neg)
    mask[label == 2.0] = 0.0
    log_p = np.maximum(np.log(pred), -100.0)
    log_1mp = np.maximum(np.log(1.0 - pred), -100.0)
    cost = (mask * -(label * log_p + (1.0 - label) * log_1mp)).sum()

    label_w = (label != 0.0).astype(np.float64)
    tex_total = 0.0
    bdr_total = 0.0
    B, C, H, W = pred.shape
    for b in range(B):
        for c in range(C):
            p, lw = pred[b, c], label_w[b, c]
            # textureloss
            pred_sums = _np_box(p, 1)
            label_sums = _np_box(lw, 4)
            t_loss = -np.log(np.clip(1.0 - pred_sums / 9.0, 1e-10, 1.0 - 1e-10))
            t_loss[label_sums > 0.0] = 0.0
            tex_total += t_loss.sum()
            # bdrloss
            pred_bdr_sum = lw * _np_box(p * lw, 4)
            texture_mask = _np_box(lw, 4)
            m = (texture_mask != 0.0).astype(np.float64)
            m[lw == 1.0] = 0.0
            pred_texture_sum = _np_box(p * (1.0 - lw) * m, 4)
            softmax_map = np.clip(
                pred_bdr_sum / (pred_texture_sum + pred_bdr_sum + 1e-10),
                1e-10, 1.0 - 1e-10)
            b_cost = -lw * np.log(softmax_map)
            b_cost[lw == 0.0] = 0.0
            bdr_total += b_cost.sum()

    return cost + bdr_factor * bdr_total + tex_factor * tex_total


if __name__ == "__main__":
    key = jax.random.PRNGKey(0)
    k1, k2 = jax.random.split(key)
    B, C, H, W = 2, 1, 16, 16
    # predictions in (0, 1), labels in {0, 1, 2}
    inputs = jax.nn.sigmoid(jax.random.normal(k1, (B, C, H, W), jnp.float32))
    targets = jax.random.randint(k2, (B, C, H, W), 0, 3).astype(jnp.float32)
    l_weight = (0.3, 0.7)  # (tex_factor, bdr_factor)

    loss = rcf_loss(inputs, targets, l_weight=l_weight)
    loss = jax.block_until_ready(loss)

    ref = _ref_rcf_loss(np.asarray(inputs), np.asarray(targets), l_weight)
    np.testing.assert_allclose(float(loss), float(ref), rtol=1e-3)

    print("KERNEL_OK")
</pallas_src>

<mosaic_0001>
module attributes {stable_mosaic.version = 11 : i64} {
  func.func @_rcf_partials_kernel(%arg0: i32, %arg1: memref<1x16x16xf32, #tpu.memory_space<vmem>>, %arg2: memref<1x16x16xf32, #tpu.memory_space<vmem>>, %arg3: memref<1x1x8xf32, #tpu.memory_space<vmem>>) attributes {dimension_semantics = [#tpu.dimension_semantics<parallel>], iteration_bounds = array<i64: 2>, scalar_prefetch = 0 : i64, scratch_operands = 0 : i64, tpu.core_type = #tpu.core_type<tc>, window_params = [{transform_indices = @transform_0, window_bounds = array<i64: 1, 16, 16>}, {transform_indices = @transform_1, window_bounds = array<i64: 1, 16, 16>}, {transform_indices = @transform_2, window_bounds = array<i64: 1, 1, 8>}]} {
    %c0 = arith.constant 0 : index
    %c0_0 = arith.constant 0 : index
    %c0_1 = arith.constant 0 : index
    %0 = vector.load %arg1[%c0, %c0_0, %c0_1] : memref<1x16x16xf32, #tpu.memory_space<vmem>>, vector<1x16x16xf32>
    %1 = vector.shape_cast %0 : vector<1x16x16xf32> to vector<16x16xf32>
    %c0_2 = arith.constant 0 : index
    %c0_3 = arith.constant 0 : index
    %c0_4 = arith.constant 0 : index
    %2 = vector.load %arg2[%c0_2, %c0_3, %c0_4] : memref<1x16x16xf32, #tpu.memory_space<vmem>>, vector<1x16x16xf32>
    %3 = vector.shape_cast %2 : vector<1x16x16xf32> to vector<16x16xf32>
    %4 = math.log %1 : vector<16x16xf32>
    %cst = arith.constant -1.000000e+02 : f32
    %5 = vector.broadcast %cst : f32 to vector<16x16xf32>
    %6 = arith.maximumf %4, %5 : vector<16x16xf32>
    %cst_5 = arith.constant 1.000000e+00 : f32
    %7 = vector.broadcast %cst_5 : f32 to vector<16x16xf32>
    %8 = arith.subf %7, %1 : vector<16x16xf32>
    %9 = math.log %8 : vector<16x16xf32>
    %cst_6 = arith.constant -1.000000e+02 : f32
    %10 = vector.broadcast %cst_6 : f32 to vector<16x16xf32>
    %11 = arith.maximumf %9, %10 : vector<16x16xf32>
    %cst_7 = arith.constant 1.000000e+00 : f32
    %12 = vector.broadcast %cst_7 : f32 to vector<16x16xf32>
    %13 = arith.cmpf oeq, %3, %12 : vector<16x16xf32>
    %cst_8 = arith.constant 0.000000e+00 : f32
    %14 = vector.broadcast %cst_8 : f32 to vector<16x16xf32>
    %15 = arith.cmpf oeq, %3, %14 : vector<16x16xf32>
    %cst_9 = arith.constant 0.000000e+00 : f32
    %16 = vector.broadcast %cst_9 : f32 to vector<16x16xf32>
    %17 = arith.subf %16, %6 : vector<16x16xf32>
    %cst_10 = arith.constant 0.000000e+00 : f32
    %18 = vector.broadcast %cst_10 : f32 to vector<16x16xf32>
    %19 = arith.select %13, %17, %18 : vector<16x16xi1>, vector<16x16xf32>
    %20 = vector.shape_cast %19 : vector<16x16xf32> to vector<1x16x16xf32>
    %cst_11 = arith.constant dense<0.000000e+00> : vector<1xf32>
    %21 = vector.multi_reduction <add>, %20, %cst_11 [1, 2] : vector<1x16x16xf32> to vector<1xf32>
    %22 = vector.shape_cast %21 : vector<1xf32> to vector<1x1x1xf32>
    %23 = vector.extract %22[0, 0, 0] : f32 from vector<1x1x1xf32>
    %24 = vector.broadcast %23 : f32 to vector<1x1xf32>
    %cst_12 = arith.constant 0.000000e+00 : f32
    %25 = vector.broadcast %cst_12 : f32 to vector<16x16xf32>
    %26 = arith.subf %25, %11 : vector<16x16xf32>
    %cst_13 = arith.constant 0.000000e+00 : f32
    %27 = vector.broadcast %cst_13 : f32 to vector<16x16xf32>
    %28 = arith.select %15, %26, %27 : vector<16x16xi1>, vector<16x16xf32>
    %29 = vector.shape_cast %28 : vector<16x16xf32> to vector<1x16x16xf32>
    %cst_14 = arith.constant dense<0.000000e+00> : vector<1xf32>
    %30 = vector.multi_reduction <add>, %29, %cst_14 [1, 2] : vector<1x16x16xf32> to vector<1xf32>
    %31 = vector.shape_cast %30 : vector<1xf32> to vector<1x1x1xf32>
    %32 = vector.extract %31[0, 0, 0] : f32 from vector<1x1x1xf32>
    %33 = vector.broadcast %32 : f32 to vector<1x1xf32>
    %34 = arith.extui %13 : vector<16x16xi1> to vector<16x16xi32>
    %35 = arith.sitofp %34 : vector<16x16xi32> to vector<16x16xf32>
    %36 = vector.shape_cast %35 : vector<16x16xf32> to vector<1x16x16xf32>
    %cst_15 = arith.constant dense<0.000000e+00> : vector<1xf32>
    %37 = vector.multi_reduction <add>, %36, %cst_15 [1, 2] : vector<1x16x16xf32> to vector<1xf32>
    %38 = vector.shape_cast %37 : vector<1xf32> to vector<1x1x1xf32>
    %39 = vector.extract %38[0, 0, 0] : f32 from vector<1x1x1xf32>
    %40 = vector.broadcast %39 : f32 to vector<1x1xf32>
    %41 = arith.extui %15 : vector<16x16xi1> to vector<16x16xi32>
    %42 = arith.sitofp %41 : vector<16x16xi32> to vector<16x16xf32>
    %43 = vector.shape_cast %42 : vector<16x16xf32> to vector<1x16x16xf32>
    %cst_16 = arith.constant dense<0.000000e+00> : vector<1xf32>
    %44 = vector.multi_reduction <add>, %43, %cst_16 [1, 2] : vector<1x16x16xf32> to vector<1xf32>
    %45 = vector.shape_cast %44 : vector<1xf32> to vector<1x1x1xf32>
    %46 = vector.extract %45[0, 0, 0] : f32 from vector<1x1x1xf32>
    %47 = vector.broadcast %46 : f32 to vector<1x1xf32>
    %cst_17 = arith.constant 0.000000e+00 : f32
    %48 = vector.broadcast %cst_17 : f32 to vector<16x16xf32>
    %49 = arith.cmpf one, %3, %48 : vector<16x16xf32>
    %50 = arith.extui %49 : vector<16x16xi1> to vector<16x16xi32>
    %51 = arith.sitofp %50 : vector<16x16xi32> to vector<16x16xf32>
    %52 = vector.shape_cast %51 : vector<16x16xf32> to vector<1x16x16xf32>
    %53 = arith.mulf %1, %51 : vector<16x16xf32>
    %54 = vector.shape_cast %53 : vector<16x16xf32> to vector<1x16x16xf32>
    %55 = tpu.concatenate %52, %54 in 0 : vector<1x16x16xf32>, vector<1x16x16xf32> -> vector<2x16x16xf32>
    %cst_18 = arith.constant 0.000000e+00 : f32
    %56 = vector.broadcast %cst_18 : f32 to vector<2x4x16xf32>
    %57 = tpu.concatenate %56, %55, %56 in 1 : vector<2x4x16xf32>, vector<2x16x16xf32>, vector<2x4x16xf32> -> vector<2x24x16xf32>
    %58 = vector.extract_strided_slice %57 {offsets = [0, 0, 0], sizes = [2, 16, 16], strides = [1, 1, 1]} : vector<2x24x16xf32> to vector<2x16x16xf32>
    %59 = vector.extract_strided_slice %57 {offsets = [0, 1, 0], sizes = [2, 16, 16], strides = [1, 1, 1]} : vector<2x24x16xf32> to vector<2x16x16xf32>
    %60 = arith.addf %58, %59 : vector<2x16x16xf32>
    %61 = vector.extract_strided_slice %57 {offsets = [0, 2, 0], sizes = [2, 16, 16], strides = [1, 1, 1]} : vector<2x24x16xf32> to vector<2x16x16xf32>
    %62 = arith.addf %60, %61 : vector<2x16x16xf32>
    %63 = vector.extract_strided_slice %57 {offsets = [0, 3, 0], sizes = [2, 16, 16], strides = [1, 1, 1]} : vector<2x24x16xf32> to vector<2x16x16xf32>
    %64 = arith.addf %62, %63 : vector<2x16x16xf32>
    %65 = vector.extract_strided_slice %57 {offsets = [0, 4, 0], sizes = [2, 16, 16], strides = [1, 1, 1]} : vector<2x24x16xf32> to vector<2x16x16xf32>
    %66 = arith.addf %64, %65 : vector<2x16x16xf32>
    %67 = vector.extract_strided_slice %57 {offsets = [0, 5, 0], sizes = [2, 16, 16], strides = [1, 1, 1]} : vector<2x24x16xf32> to vector<2x16x16xf32>
    %68 = arith.addf %66, %67 : vector<2x16x16xf32>
    %69 = vector.extract_strided_slice %57 {offsets = [0, 6, 0], sizes = [2, 16, 16], strides = [1, 1, 1]} : vector<2x24x16xf32> to vector<2x16x16xf32>
    %70 = arith.addf %68, %69 : vector<2x16x16xf32>
    %71 = vector.extract_strided_slice %57 {offsets = [0, 7, 0], sizes = [2, 16, 16], strides = [1, 1, 1]} : vector<2x24x16xf32> to vector<2x16x16xf32>
    %72 = arith.addf %70, %71 : vector<2x16x16xf32>
    %73 = vector.extract_strided_slice %57 {offsets = [0, 8, 0], sizes = [2, 16, 16], strides = [1, 1, 1]} : vector<2x24x16xf32> to vector<2x16x16xf32>
    %74 = arith.addf %72, %73 : vector<2x16x16xf32>
    %cst_19 = arith.constant 0.000000e+00 : f32
    %75 = vector.broadcast %cst_19 : f32 to vector<2x16x4xf32>
    %76 = tpu.concatenate %75, %74, %75 in 2 : vector<2x16x4xf32>, vector<2x16x16xf32>, vector<2x16x4xf32> -> vector<2x16x24xf32>
    %77 = vector.extract_strided_slice %76 {offsets = [0, 0, 0], sizes = [2, 16, 16], strides = [1, 1, 1]} : vector<2x16x24xf32> to vector<2x16x16xf32>
    %78 = vector.extract_strided_slice %76 {offsets = [0, 0, 1], sizes = [2, 16, 16], strides = [1, 1, 1]} : vector<2x16x24xf32> to vector<2x16x16xf32>
    %79 = arith.addf %77, %78 : vector<2x16x16xf32>
    %80 = vector.extract_strided_slice %76 {offsets = [0, 0, 2], sizes = [2, 16, 16], strides = [1, 1, 1]} : vector<2x16x24xf32> to vector<2x16x16xf32>
    %81 = arith.addf %79, %80 : vector<2x16x16xf32>
    %82 = vector.extract_strided_slice %76 {offsets = [0, 0, 3], sizes = [2, 16, 16], strides = [1, 1, 1]} : vector<2x16x24xf32> to vector<2x16x16xf32>
    %83 = arith.addf %81, %82 : vector<2x16x16xf32>
    %84 = vector.extract_strided_slice %76 {offsets = [0, 0, 4], sizes = [2, 16, 16], strides = [1, 1, 1]} : vector<2x16x24xf32> to vector<2x16x16xf32>
    %85 = arith.addf %83, %84 : vector<2x16x16xf32>
    %86 = vector.extract_strided_slice %76 {offsets = [0, 0, 5], sizes = [2, 16, 16], strides = [1, 1, 1]} : vector<2x16x24xf32> to vector<2x16x16xf32>
    %87 = arith.addf %85, %86 : vector<2x16x16xf32>
    %88 = vector.extract_strided_slice %76 {offsets = [0, 0, 6], sizes = [2, 16, 16], strides = [1, 1, 1]} : vector<2x16x24xf32> to vector<2x16x16xf32>
    %89 = arith.addf %87, %88 : vector<2x16x16xf32>
    %90 = vector.extract_strided_slice %76 {offsets = [0, 0, 7], sizes = [2, 16, 16], strides = [1, 1, 1]} : vector<2x16x24xf32> to vector<2x16x16xf32>
    %91 = arith.addf %89, %90 : vector<2x16x16xf32>
    %92 = vector.extract_strided_slice %76 {offsets = [0, 0, 8], sizes = [2, 16, 16], strides = [1, 1, 1]} : vector<2x16x24xf32> to vector<2x16x16xf32>
    %93 = arith.addf %91, %92 : vector<2x16x16xf32>
    %94 = vector.extract_strided_slice %93 {offsets = [0, 0, 0], sizes = [1, 16, 16], strides = [1, 1, 1]} : vector<2x16x16xf32> to vector<1x16x16xf32>
    %95 = vector.shape_cast %94 : vector<1x16x16xf32> to vector<16x16xf32>
    %96 = vector.extract_strided_slice %93 {offsets = [1, 0, 0], sizes = [1, 16, 16], strides = [1, 1, 1]} : vector<2x16x16xf32> to vector<1x16x16xf32>
    %97 = vector.shape_cast %96 : vector<1x16x16xf32> to vector<16x16xf32>
    %98 = arith.mulf %51, %97 : vector<16x16xf32>
    %cst_20 = arith.constant 0.000000e+00 : f32
    %99 = vector.broadcast %cst_20 : f32 to vector<1x16xf32>
    %100 = tpu.concatenate %99, %1, %99 in 0 : vector<1x16xf32>, vector<16x16xf32>, vector<1x16xf32> -> vector<18x16xf32>
    %101 = vector.extract_strided_slice %100 {offsets = [0, 0], sizes = [16, 16], strides = [1, 1]} : vector<18x16xf32> to vector<16x16xf32>
    %102 = vector.extract_strided_slice %100 {offsets = [1, 0], sizes = [16, 16], strides = [1, 1]} : vector<18x16xf32> to vector<16x16xf32>
    %103 = arith.addf %101, %102 : vector<16x16xf32>
    %104 = vector.extract_strided_slice %100 {offsets = [2, 0], sizes = [16, 16], strides = [1, 1]} : vector<18x16xf32> to vector<16x16xf32>
    %105 = arith.addf %103, %104 : vector<16x16xf32>
    %cst_21 = arith.constant 0.000000e+00 : f32
    %106 = vector.broadcast %cst_21 : f32 to vector<16x1xf32>
    %107 = tpu.concatenate %106, %105, %106 in 1 : vector<16x1xf32>, vector<16x16xf32>, vector<16x1xf32> -> vector<16x18xf32>
    %108 = vector.extract_strided_slice %107 {offsets = [0, 0], sizes = [16, 16], strides = [1, 1]} : vector<16x18xf32> to vector<16x16xf32>
    %109 = vector.extract_strided_slice %107 {offsets = [0, 1], sizes = [16, 16], strides = [1, 1]} : vector<16x18xf32> to vector<16x16xf32>
    %110 = arith.addf %108, %109 : vector<16x16xf32>
    %111 = vector.extract_strided_slice %107 {offsets = [0, 2], sizes = [16, 16], strides = [1, 1]} : vector<16x18xf32> to vector<16x16xf32>
    %112 = arith.addf %110, %111 : vector<16x16xf32>
    %cst_22 = arith.constant 9.000000e+00 : f32
    %113 = vector.broadcast %cst_22 : f32 to vector<16x16xf32>
    %114 = arith.divf %112, %113 : vector<16x16xf32>
    %cst_23 = arith.constant 1.000000e+00 : f32
    %115 = vector.broadcast %cst_23 : f32 to vector<16x16xf32>
    %116 = arith.subf %115, %114 : vector<16x16xf32>
    %cst_24 = arith.constant 1.000000e-10 : f32
    %cst_25 = arith.constant 1.000000e+00 : f32
    %117 = vector.broadcast %cst_24 : f32 to vector<16x16xf32>
    %118 = arith.maximumf %117, %116 : vector<16x16xf32>
    %119 = vector.broadcast %cst_25 : f32 to vector<16x16xf32>
    %120 = arith.minimumf %119, %118 : vector<16x16xf32>
    %121 = math.log %120 : vector<16x16xf32>
    %cst_26 = arith.constant 0.000000e+00 : f32
    %122 = vector.broadcast %cst_26 : f32 to vector<16x16xf32>
    %123 = arith.subf %122, %121 : vector<16x16xf32>
    %cst_27 = arith.constant 0.000000e+00 : f32
    %124 = vector.broadcast %cst_27 : f32 to vector<16x16xf32>
    %125 = arith.cmpf ogt, %95, %124 : vector<16x16xf32>
    %cst_28 = arith.constant 0.000000e+00 : f32
    %126 = vector.broadcast %cst_28 : f32 to vector<16x16xf32>
    %127 = arith.select %125, %126, %123 : vector<16x16xi1>, vector<16x16xf32>
    %128 = vector.shape_cast %127 : vector<16x16xf32> to vector<1x16x16xf32>
    %cst_29 = arith.constant dense<0.000000e+00> : vector<1xf32>
    %129 = vector.multi_reduction <add>, %128, %cst_29 [1, 2] : vector<1x16x16xf32> to vector<1xf32>
    %130 = vector.shape_cast %129 : vector<1xf32> to vector<1x1x1xf32>
    %131 = vector.extract %130[0, 0, 0] : f32 from vector<1x1x1xf32>
    %132 = vector.broadcast %131 : f32 to vector<1x1xf32>
    %cst_30 = arith.constant 1.000000e+00 : f32
    %133 = vector.broadcast %cst_30 : f32 to vector<16x16xf32>
    %134 = arith.cmpf oeq, %51, %133 : vector<16x16xf32>
    %cst_31 = arith.constant 0.000000e+00 : f32
    %135 = vector.broadcast %cst_31 : f32 to vector<16x16xf32>
    %136 = arith.cmpf one, %95, %135 : vector<16x16xf32>
    %137 = arith.extui %136 : vector<16x16xi1> to vector<16x16xi32>
    %138 = arith.sitofp %137 : vector<16x16xi32> to vector<16x16xf32>
    %cst_32 = arith.constant 0.000000e+00 : f32
    %139 = vector.broadcast %cst_32 : f32 to vector<16x16xf32>
    %140 = arith.select %134, %139, %138 : vector<16x16xi1>, vector<16x16xf32>
    %141 = arith.mulf %1, %140 : vector<16x16xf32>
    %cst_33 = arith.constant 0.000000e+00 : f32
    %142 = vector.broadcast %cst_33 : f32 to vector<4x16xf32>
    %143 = tpu.concatenate %142, %141, %142 in 0 : vector<4x16xf32>, vector<16x16xf32>, vector<4x16xf32> -> vector<24x16xf32>
    %144 = vector.extract_strided_slice %143 {offsets = [0, 0], sizes = [16, 16], strides = [1, 1]} : vector<24x16xf32> to vector<16x16xf32>
    %145 = vector.extract_strided_slice %143 {offsets = [1, 0], sizes = [16, 16], strides = [1, 1]} : vector<24x16xf32> to vector<16x16xf32>
    %146 = arith.addf %144, %145 : vector<16x16xf32>
    %147 = vector.extract_strided_slice %143 {offsets = [2, 0], sizes = [16, 16], strides = [1, 1]} : vector<24x16xf32> to vector<16x16xf32>
    %148 = arith.addf %146, %147 : vector<16x16xf32>
    %149 = vector.extract_strided_slice %143 {offsets = [3, 0], sizes = [16, 16], strides = [1, 1]} : vector<24x16xf32> to vector<16x16xf32>
    %150 = arith.addf %148, %149 : vector<16x16xf32>
    %151 = vector.extract_strided_slice %143 {offsets = [4, 0], sizes = [16, 16], strides = [1, 1]} : vector<24x16xf32> to vector<16x16xf32>
    %152 = arith.addf %150, %151 : vector<16x16xf32>
    %153 = vector.extract_strided_slice %143 {offsets = [5, 0], sizes = [16, 16], strides = [1, 1]} : vector<24x16xf32> to vector<16x16xf32>
    %154 = arith.addf %152, %153 : vector<16x16xf32>
    %155 = vector.extract_strided_slice %143 {offsets = [6, 0], sizes = [16, 16], strides = [1, 1]} : vector<24x16xf32> to vector<16x16xf32>
    %156 = arith.addf %154, %155 : vector<16x16xf32>
    %157 = vector.extract_strided_slice %143 {offsets = [7, 0], sizes = [16, 16], strides = [1, 1]} : vector<24x16xf32> to vector<16x16xf32>
    %158 = arith.addf %156, %157 : vector<16x16xf32>
    %159 = vector.extract_strided_slice %143 {offsets = [8, 0], sizes = [16, 16], strides = [1, 1]} : vector<24x16xf32> to vector<16x16xf32>
    %160 = arith.addf %158, %159 : vector<16x16xf32>
    %cst_34 = arith.constant 0.000000e+00 : f32
    %161 = vector.broadcast %cst_34 : f32 to vector<16x4xf32>
    %162 = tpu.concatenate %161, %160, %161 in 1 : vector<16x4xf32>, vector<16x16xf32>, vector<16x4xf32> -> vector<16x24xf32>
    %163 = vector.extract_strided_slice %162 {offsets = [0, 0], sizes = [16, 16], strides = [1, 1]} : vector<16x24xf32> to vector<16x16xf32>
    %164 = vector.extract_strided_slice %162 {offsets = [0, 1], sizes = [16, 16], strides = [1, 1]} : vector<16x24xf32> to vector<16x16xf32>
    %165 = arith.addf %163, %164 : vector<16x16xf32>
    %166 = vector.extract_strided_slice %162 {offsets = [0, 2], sizes = [16, 16], strides = [1, 1]} : vector<16x24xf32> to vector<16x16xf32>
    %167 = arith.addf %165, %166 : vector<16x16xf32>
    %168 = vector.extract_strided_slice %162 {offsets = [0, 3], sizes = [16, 16], strides = [1, 1]} : vector<16x24xf32> to vector<16x16xf32>
    %169 = arith.addf %167, %168 : vector<16x16xf32>
    %170 = vector.extract_strided_slice %162 {offsets = [0, 4], sizes = [16, 16], strides = [1, 1]} : vector<16x24xf32> to vector<16x16xf32>
    %171 = arith.addf %169, %170 : vector<16x16xf32>
    %172 = vector.extract_strided_slice %162 {offsets = [0, 5], sizes = [16, 16], strides = [1, 1]} : vector<16x24xf32> to vector<16x16xf32>
    %173 = arith.addf %171, %172 : vector<16x16xf32>
    %174 = vector.extract_strided_slice %162 {offsets = [0, 6], sizes = [16, 16], strides = [1, 1]} : vector<16x24xf32> to vector<16x16xf32>
    %175 = arith.addf %173, %174 : vector<16x16xf32>
    %176 = vector.extract_strided_slice %162 {offsets = [0, 7], sizes = [16, 16], strides = [1, 1]} : vector<16x24xf32> to vector<16x16xf32>
    %177 = arith.addf %175, %176 : vector<16x16xf32>
    %178 = vector.extract_strided_slice %162 {offsets = [0, 8], sizes = [16, 16], strides = [1, 1]} : vector<16x24xf32> to vector<16x16xf32>
    %179 = arith.addf %177, %178 : vector<16x16xf32>
    %180 = arith.addf %179, %98 : vector<16x16xf32>
    %cst_35 = arith.constant 1.000000e-10 : f32
    %181 = vector.broadcast %cst_35 : f32 to vector<16x16xf32>
    %182 = arith.addf %180, %181 : vector<16x16xf32>
    %183 = arith.divf %98, %182 : vector<16x16xf32>
    %cst_36 = arith.constant 1.000000e-10 : f32
    %cst_37 = arith.constant 1.000000e+00 : f32
    %184 = vector.broadcast %cst_36 : f32 to vector<16x16xf32>
    %185 = arith.maximumf %184, %183 : vector<16x16xf32>
    %186 = vector.broadcast %cst_37 : f32 to vector<16x16xf32>
    %187 = arith.minimumf %186, %185 : vector<16x16xf32>
    %cst_38 = arith.constant 0.000000e+00 : f32
    %188 = vector.broadcast %cst_38 : f32 to vector<16x16xf32>
    %189 = arith.subf %188, %51 : vector<16x16xf32>
    %190 = math.log %187 : vector<16x16xf32>
    %191 = arith.mulf %189, %190 : vector<16x16xf32>
    %192 = vector.shape_cast %191 : vector<16x16xf32> to vector<1x16x16xf32>
    %cst_39 = arith.constant dense<0.000000e+00> : vector<1xf32>
    %193 = vector.multi_reduction <add>, %192, %cst_39 [1, 2] : vector<1x16x16xf32> to vector<1xf32>
    %194 = vector.shape_cast %193 : vector<1xf32> to vector<1x1x1xf32>
    %195 = vector.extract %194[0, 0, 0] : f32 from vector<1x1x1xf32>
    %196 = vector.broadcast %195 : f32 to vector<1x1xf32>
    %cst_40 = arith.constant 0.000000e+00 : f32
    %197 = vector.broadcast %cst_40 : f32 to vector<1x1xf32>
    %198 = tpu.concatenate %24, %33, %40, %47, %132, %196, %197, %197 in 1 : vector<1x1xf32>, vector<1x1xf32>, vector<1x1xf32>, vector<1x1xf32>, vector<1x1xf32>, vector<1x1xf32>, vector<1x1xf32>, vector<1x1xf32> -> vector<1x8xf32>
    %c0_41 = arith.constant 0 : index
    %c0_42 = arith.constant 0 : index
    %c0_43 = arith.constant 0 : index
    %199 = vector.load %arg3[%c0_41, %c0_42, %c0_43] : memref<1x1x8xf32, #tpu.memory_space<vmem>>, vector<1x1x8xf32>
    %200 = vector.shape_cast %199 : vector<1x1x8xf32> to vector<1x8xf32>
    %201 = vector.shape_cast %198 : vector<1x8xf32> to vector<1x1x8xf32>
    tpu.vector_store %arg3[%c0_41, %c0_42, %c0_43], %201 {strides = array<i32>} : memref<1x1x8xf32, #tpu.memory_space<vmem>>, vector<1x1x8xf32>,
    return
  }
  func.func @transform_0(%arg0: i32) -> (i32, i32, i32) {
    %c0_i32 = arith.constant 0 : i32
    %c0_i32_0 = arith.constant 0 : i32
    %c0_i32_1 = arith.constant 0 : i32
    return %arg0, %c0_i32, %c0_i32_0 : i32, i32, i32
  }
  func.func @transform_1(%arg0: i32) -> (i32, i32, i32) {
    %c0_i32 = arith.constant 0 : i32
    %c0_i32_0 = arith.constant 0 : i32
    %c0_i32_1 = arith.constant 0 : i32
    return %arg0, %c0_i32, %c0_i32_0 : i32, i32, i32
  }
  func.func @transform_2(%arg0: i32) -> (i32, i32, i32) {
    %c0_i32 = arith.constant 0 : i32
    %c0_i32_0 = arith.constant 0 : i32
    %c0_i32_1 = arith.constant 0 : i32
    return %arg0, %c0_i32, %c0_i32_0 : i32, i32, i32
  }
}

</mosaic_0001>

<bundles_post_ra>
// kernel: tpu_custom_call.1
= control target key start
LH: loop header
LB: loop body
LE: loop exit
PB: predicated region body
PF: predicated region fallthrough
CT: control target
= control target key end

     0   :  { %7 = vsyncpa [#allocation3], 0  ;;  %s1875_s0 = inlined_call_operand.hbm [shape: f32[2,16,16], index: 0, kind: input, shape index: {}]   ;;  %s1876_s1 = inlined_call_operand.hbm [shape: f32[2,16,16], index: 1, kind: input, shape index: {}]   ;;  %s1877_s2 = inlined_call_operand.hbm [shape: f32[2,1,8], index: 2, kind: output, shape index: {}]  }
   0x1   :  { %9 = vsyncpa [#allocation3 + $0x1], 0 }
   0x2   :  { %10 = vsyncpa [#allocation6], 0 }
   0x3   :  { %12 = vsyncpa [#allocation6 + $0x1], 0 }
   0x4   :  { %13 = vsyncpa [#allocation4], 0 }
   0x5   :  { %15 = vsyncpa [#allocation4 + $0x1], 0  ;;  %s1315_s9 = smov 0   ;;  %s1317_s10 = smov 0  }
   0x6   :  { %s1319_s11 = smov 0   ;;  %s1321_s12 = smov 0  }
   0x7 LB: > { %s1336_s13 = sadd.s32 4294967295, %s1282_s12   ;;  %s1031_s14 = sadd.s32 4294967294, %s1282_s12   ;;  %s1282_s12 = sphi %s1321_s12, %s1893_s12   ;;  %s1278_s11 = sphi %s1319_s11, %s1892_s11   ;;  %s1274_s10 = sphi %s1317_s10, %s1891_s10   ;;  %s1270_s9 = sphi %s1315_s9, %s1890_s9  }
   0x8   : > { %s1340_s15 = sadd.s32 1, %s1282_s12   ;;  %s28_s16 = sadd.s32 1, %s1278_s11 }
   0x9   : > { %s25_s17 = ssub.s32 %s1282_s12, %s1340_s15  ;;  %p35_p0 = scmp.ne.s32.totalorder %s1278_s11, %s1274_s10 }
   0xa   : > { %p26_p1 = scmp.eq.s32.totalorder %s25_s17, 0  ;;  %p36_p2 = scmp.eq.s32.totalorder %s1282_s12, 0 }
   0xb   : > { %p41_p3 = scmp.ne.s32.totalorder %s1274_s10, %s1270_s9  ;;  %p42_p4 = scmp.eq.s32.totalorder %s1336_s13, 0 }
   0xc   : > { %s1352_s18 = scalar_select %p26_p1, %s1278_s11, %s28_s16  }
   0xd   : > { %p1354_p5 = por %p36_p2, %p35_p0  ;;  %p1358_p6 = por %p42_p4, %p41_p3 }
   0xe   : > { %p91_p7 = scmp.eq.s32.totalorder %s1336_s13, 1  ;;  %p97_p8 = scmp.eq.s32.totalorder %s1031_s14, 1 }
   0xf   : > { %s1881_s20 = scalar_select %p1358_p6, 1, 0 }
  0x10   : > { %p1085_p10 = scmp.lt.s32.totalorder %s1282_s12, 2  ;;  %p1365_p11 = por %p91_p7, %p35_p0 }
  0x11   : > { %p1369_p12 = por %p97_p8, %p41_p3  ;;  %s1374_s23 = sand.u32 1, %s1278_s11  }
  0x12   : > { %s1882_s21 = scalar_select %p1365_p11, 1, 0 }
  0x13   : > { %s1883_s22 = scalar_select %p1369_p12, 1, 0 }
  0x14   : > { %s1054_s24 = sshll.u32 %s1282_s12, 8  ;;  %s1034_s25 = sshll.u32 %s1374_s23, 4 }
  0x15   : > { %s1383_s28 = scalar_lea.hbm %s1875_s0, %s1054_s24  ;;  %s121_s29 = scalar_lea.vmem [#allocation2], %s1034_s25 }
  0x16   : > { %s128_s30 = sshll.u32 %s121_s29, 4  ;;  %p1389_p13 = pnand %p1085_p10, %p1354_p5  ;;  %s1393_s30 = int_to_ptr.vmem [resolvable:$true] %s128_s30 }
  0x17   : > { %s118_s4 = scalar_lea.sflag [#allocation3], %s1374_s23  ;;  %s1152_s5 = scalar_lea.hbm %s1383_s28, 256 }
  0x18   : > { %p1153_p0 = scmp.ne.s32.totalorder %s1383_s28, %s1152_s5  ;;  %p1154_p1 = pneg %p1389_p13 }
  0x19   : > { %s1157_s8 = scalar_lea.hbm %s1875_s0, 512  ;;  %p1158_p4 = scmp.lt.u32.totalorder %s1383_s28, %s1875_s0 }
  0x1a   : > { %p1155_p2 = pnand %p1154_p1, %p1153_p0  ;;  %p1159_p5 = scmp.lt.u32.totalorder %s1157_s8, %s1152_s5 }
  0x1b   : > { %p1161_p8 = scmp.lt.u32.totalorder %s1152_s5, %s1383_s28 }
  0x1c   : > { %p1156_p3 = pneg %p1155_p2  ;;  %p1160_p7 = por %p1159_p5, %p1158_p4 }
  0x1e   : > { %p1162_p10 = por %p1161_p8, %p1160_p7 }
  0x20   : > { %p1163_p9 = pnand %p1162_p10, %p1156_p3 }
  0x22   : > { %1166 = shalt.err (!%p1163_p9)
}
  0x23   : > { %s1167_s17 = scalar_lea.vmem %s1393_s30, 256  ;;  %s1284_s19 = smov [#allocation2]  }
  0x24   : > { %p1168_p0 = scmp.ne.s32.totalorder %s1393_s30, %s1167_s17  ;;  %s1172_s26 = sshll.u32 %s1284_s19, 4  ;;  %s1173_s26 = int_to_ptr.vmem [resolvable:$false] %s1172_s26 }
  0x25   : > { %s1174_s27 = scalar_lea.vmem %s1173_s26, 512  ;;  %p1175_p11 = scmp.lt.s32.totalorder %s1393_s30, %s1173_s26 }
  0x26   : > { %p1170_p2 = pnand %p1168_p0, %p1154_p1  ;;  %p1176_p4 = scmp.lt.s32.totalorder %s1174_s27, %s1167_s17 }
  0x28   : > { %p1171_p12 = pneg %p1170_p2  ;;  %p1177_p5 = por %p1176_p4, %p1175_p11 }
  0x2a   : > { %p1178_p7 = pnand %p1177_p5, %p1171_p12 }
  0x2c   : > { %1181 = shalt.err (!%p1178_p7)
}
  0x2d   : > { %s1285_s29 = smov 128   ;;  %s1286_s5 = smov 8  }
  0x2e   : > { %1077 = dma.hbm_to_vmem [thread:$0]  (!%p1389_p13), %s1383_s28, 256, %s1393_s30, %s118_s4, %s1285_s29, %s1285_s29, %s1286_s5  }
  0x2f   : > { %p1040_p9 = scmp.ge.s32.totalorder %s1282_s12, 1  ;;  %p157_p11 = scmp.lt.s32.totalorder %s1282_s12, 3 }
  0x30   : > { %s1437_s14 = scalar_lea.hbm %s1876_s1, %s1054_s24  ;;  %s142_s16 = scalar_lea.vmem [#allocation5], %s1034_s25 }
  0x31   : > { %p1428_p12 = pnand %p1040_p9, %p157_p11  ;;  %s149_s17 = sshll.u32 %s142_s16, 4  ;;  %s1441_s17 = int_to_ptr.vmem [resolvable:$true] %s149_s17 }
  0x32   : > { %s139_s28 = scalar_lea.sflag [#allocation6], %s1374_s23  ;;  %s1182_s30 = scalar_lea.hbm %s1437_s14, 256 }
  0x33   : > { %p1183_p3 = scmp.ne.s32.totalorder %s1437_s14, %s1182_s30  ;;  %s1187_s24 = scalar_lea.hbm %s1876_s1, 512 }
  0x34   : > { %p1188_p0 = scmp.lt.u32.totalorder %s1437_s14, %s1876_s1  ;;  %p1189_p2 = scmp.lt.u32.totalorder %s1187_s24, %s1182_s30 }
  0x35   : > { %p1185_p8 = pnand %p1183_p3, %p1154_p1  ;;  %p1191_p5 = scmp.lt.u32.totalorder %s1182_s30, %s1437_s14 }
  0x36   : > { %p1190_p4 = por %p1189_p2, %p1188_p0 }
  0x37   : > { %p1186_p10 = pneg %p1185_p8 }
  0x38   : > { %p1192_p7 = por %p1191_p5, %p1190_p4 }
  0x3a   : > { %p1193_p9 = pnand %p1192_p7, %p1186_p10 }
  0x3c   : > { %1196 = shalt.err (!%p1193_p9)
}
  0x3d   : > { %s1197_s25 = scalar_lea.vmem %s1441_s17, 256  ;;  %s1287_s7 = smov [#allocation5]  }
  0x3e   : > { %p1198_p11 = scmp.ne.s32.totalorder %s1441_s17, %s1197_s25  ;;  %s1202_s8 = sshll.u32 %s1287_s7, 4  ;;  %s1203_s8 = int_to_ptr.vmem [resolvable:$false] %s1202_s8 }
  0x3f   : > { %s1204_s16 = scalar_lea.vmem %s1203_s8, 512  ;;  %p1205_p6 = scmp.lt.s32.totalorder %s1441_s17, %s1203_s8 }
  0x40   : > { %p1200_p3 = pnand %p1198_p11, %p1154_p1  ;;  %p1206_p0 = scmp.lt.s32.totalorder %s1204_s16, %s1197_s25 }
  0x42   : > { %p1201_p8 = pneg %p1200_p3  ;;  %p1207_p2 = por %p1206_p0, %p1205_p6 }
  0x44   : > { %p1208_p4 = pnand %p1207_p2, %p1201_p8 }
  0x46   : > { %1211 = shalt.err (!%p1208_p4)
}
  0x47   : > { %1080 = dma.hbm_to_vmem [thread:$0]  (!%p1389_p13), %s1437_s14, 256, %s1441_s17, %s139_s28, %s1285_s29, %s1285_s29, %s1286_s5  }
  0x48   : > { %161 = sbr.rel (%p1428_p12) target bundleno = 924 (0x39c), region = 28  ;;  %s1475_s30 = sand.u32 (!%p1428_p12), 1, %s1274_s10  }
  0x49   : > { %s1041_s4 = sshll.u32 (!%p1428_p12), %s1475_s30, 4  ;;  %s164_s19 = scalar_lea.sflag (!%p1428_p12), [#allocation3], %s1475_s30 }
  0x4a   : > { %s1479_s3 = scalar_lea.vmem (!%p1428_p12), [#allocation2], %s1041_s4  ;;  %p1886_p6 = scmp.ne.s32.totalorder (!%p1428_p12), %s1881_s20, 0 }
  0x4f   : > { %1257 = dma.done.wait (%p1886_p6), %s164_s19, 256  }
  0x50   : > { %1259 = vsyncadd (%p1886_p6), %s164_s19, 4294967040  ;;  %s173_s23 = scalar_lea.sflag [#allocation6], %s1475_s30  ;;  %s176_s29 = scalar_lea.vmem [#allocation5], %s1041_s4 }
  0x51   : > { %1261 = dma.done.wait (%p1886_p6), %s173_s23, 256  }
  0x52   : > { %1263 = vsyncadd (%p1886_p6), %s173_s23, 4294967040  ;;  %v1490_v0 = vld [vmem:[%s176_s29] sm:$0xff]  ;;  %v1492_v1 = vld [vmem:[%s176_s29 + $0x8] sm:$0xff]  ;;  %v1288_v2 = vmov 0.0   ;;  %vm304_vm2 = vcmask 1043456   ;;  %vm325_vm3 = vcmask 1046528  }
  0x53   : > { %vm292_vm0 = vcmp.ne.f32.partialorder %v1490_v0, 0.0  ;;  %vm293_vm1 = vcmp.ne.f32.partialorder %v1492_v1, 0.0  ;;  %vm344_vm4 = vcmask 1045504   ;;  %vm363_vm5 = vcmask 1044480   ;;  %s1289_s20 = smov 4   ;;  %v1524_v61 = vld [vmem:[%s1479_s3] sm:$0xff] }
  0x54   : > { %v1497_v3 = vsel %vm292_vm0, 1.0, %v1288_v2  ;;  %v1500_v4 = vsel %vm293_vm1, 1.0, %v1288_v2  ;;  %vm400_vm6 = vcmask 1042432   ;;  %vm419_vm7 = vcmask 1041408   ;;  %v1527_v62 = vld [vmem:[%s1479_s3 + $0x8] sm:$0xff]  ;;  %s1290_s5 = smov 126  }
  0x55   : > { %v305_v5 = vrot.slane %v1497_v3, 4  ;;  %v306_v6 = vrot.slane %v1500_v4, 4  ;;  %vm438_vm8 = vcmask 1040384   ;;  %v298_v63 = vmul.f32 %v1497_v3, %v1524_v61  ;;  %s1291_s6 = smov 127   ;;  %s1292_s14 = smov 125  }
  0x56   : > { %vm477_vm9 = vcmask 31744   ;;  %vm482_vm10 = vcmask 162816   ;;  %s1293_s17 = smov 124   ;;  %s1294_s28 = smov 123   ;;  %vm715_vm12 = vcmp.eq.f32.partialorder %v1497_v3, 1.0  ;;  %vm716_vm13 = vcmp.eq.f32.partialorder %v1500_v4, 1.0 }
  0x57   : > { %v307_v7 = vsel %vm304_vm2, %v305_v5, %v306_v6  ;;  %v317_v8 = vsel %vm304_vm2, 0.0, %v305_v5  ;;  %v319_v15 = vsel %vm304_vm2, %v306_v6, 0.0  ;;  %v299_v5 = vmul.f32 %v1500_v4, %v1527_v62  ;;  %s1295_s24 = smov 122   ;;  %s1296_s26 = smov 121  }
  0x58   : > { %v326_v9 = vrot.slane %v317_v8, 1  ;;  %v327_v10 = vrot.slane %v307_v7, 1  ;;  %v345_v11 = vrot.slane %v317_v8, 2  ;;  %v346_v12 = vrot.slane %v307_v7, 2  ;;  %s1297_s27 = smov 120   ;;  %s1298_s25 = smov 1  }
  0x59   : > { %v364_v13 = vrot.slane %v317_v8, 3  ;;  %v365_v14 = vrot.slane %v307_v7, 3  ;;  %v382_v18 = vrot.slane %v317_v8, 4  ;;  %v383_v19 = vrot.slane %v307_v7, 4  ;;  %s1051_s3 = sshll.u32 %s1336_s13, 4  ;;  %s200_s29 = scalar_lea.vmem [#allocation7], %s1475_s30 }
  0x5a   : > { %v328_v16 = vsel %vm325_vm3, %v326_v9, %v327_v10  ;;  %v347_v17 = vsel %vm344_vm4, %v345_v11, %v346_v12  ;;  %v401_v22 = vrot.slane %v317_v8, 5  ;;  %v402_v23 = vrot.slane %v307_v7, 5  ;;  %s930_s13 = scalar_lea.sflag [#allocation4], %s1475_s30  ;;  %p1887_p1 = scmp.ne.s32.totalorder %s1882_s21, 0 }
  0x5b   : > { %v340_v20 = vadd.f32 %v328_v16, %v317_v8  ;;  %v366_v21 = vsel %vm363_vm5, %v364_v13, %v365_v14  ;;  %v329_v25 = vrot.slane %v319_v15, 1  ;;  %v348_v26 = vrot.slane %v319_v15, 2 }
  0x5c   : > { %v367_v27 = vrot.slane %v319_v15, 3  ;;  %v384_v28 = vsel %vm304_vm2, %v382_v18, %v383_v19  ;;  %v420_v29 = vrot.slane %v317_v8, 6  ;;  %v421_v30 = vrot.slane %v307_v7, 6 }
  0x5d   : > { %v359_v24 = vadd.f32 %v347_v17, %v340_v20  ;;  %v330_v32 = vsel %vm325_vm3, %v327_v10, %v329_v25  ;;  %v349_v33 = vsel %vm344_vm4, %v346_v12, %v348_v26  ;;  %v385_v34 = vrot.slane %v319_v15, 4 }
  0x5e   : > { %v403_v35 = vsel %vm400_vm6, %v401_v22, %v402_v23  ;;  %v439_v36 = vrot.slane %v317_v8, 7  ;;  %v440_v37 = vrot.slane %v307_v7, 7  ;;  %v341_v38 = vadd.f32 %v330_v32, %v307_v7 }
  0x5f   : > { %v378_v31 = vadd.f32 %v366_v21, %v359_v24  ;;  %v368_v40 = vsel %vm363_vm5, %v365_v14, %v367_v27  ;;  %v404_v41 = vrot.slane %v319_v15, 5  ;;  %v422_v42 = vsel %vm419_vm7, %v420_v29, %v421_v30 }
  0x60   : > { %v360_v43 = vadd.f32 %v349_v33, %v341_v38  ;;  %v386_v45 = vsel %vm304_vm2, %v383_v19, %v385_v34  ;;  %v423_v46 = vrot.slane %v319_v15, 6  ;;  %v441_v47 = vsel %vm438_vm8, %v439_v36, %v440_v37 }
  0x61   : > { %v396_v39 = vadd.f32 %v384_v28, %v378_v31  ;;  %v405_v50 = vsel %vm400_vm6, %v402_v23, %v404_v41  ;;  %v442_v51 = vrot.slane %v319_v15, 7  ;;  %v308_v6 = vrot.slane %v298_v63, 4 }
  0x62   : > { %v379_v48 = vadd.f32 %v368_v40, %v360_v43  ;;  %v424_v54 = vsel %vm419_vm7, %v421_v30, %v423_v46  ;;  %vm659_vm15 = vcmask 7168   ;;  %vm662_vm0 = vcmask 138240  }
  0x63   : > { %v415_v44 = vadd.f32 %v403_v35, %v396_v39  ;;  %v443_v57 = vsel %vm438_vm8, %v440_v37, %v442_v51  ;;  %v1537_v9 = vsel %vm304_vm2, 0.0, %v308_v6  ;;  %1132 = vlog2.f32 %v1524_v61 }
  0x64   : > { %v397_v52 = vadd.f32 %v386_v45, %v379_v48  ;;  %v331_v11 = vrot.slane %v1537_v9, 1  ;;  %v350_v14 = vrot.slane %v1537_v9, 2  ;;  %v369_v20 = vrot.slane %v1537_v9, 3 }
  0x65   : > { %v434_v49 = vadd.f32 %v422_v42, %v415_v44  ;;  %v387_v27 = vrot.slane %v1537_v9, 4  ;;  %v406_v37 = vrot.slane %v1537_v9, 5  ;;  %v425_v44 = vrot.slane %v1537_v9, 6 }
  0x66   : > { %v416_v55 = vadd.f32 %v405_v50, %v397_v52  ;;  %v444_v51 = vrot.slane %v1537_v9, 7  ;;  %1134 = vlog2.f32 %v1527_v62  ;;  %vm219_vm1 = vcmp.eq.f32.partialorder %v1490_v0, 1.0 }
  0x67   : > { %v453_v53 = vadd.f32 %v441_v47, %v434_v49 }
  0x68   : > { %v435_v58 = vadd.f32 %v424_v54, %v416_v55 }
  0x69   : > { %v457_v56 = vadd.f32 %v453_v53, %v307_v7  ;;  %v309_v7 = vrot.slane %v299_v5, 4 }
  0x6a   : > { %v454_v59 = vadd.f32 %v443_v57, %v435_v58 }
  0x6b   : > { %465 = vrot.lane.b32.xlu0 %v457_v56, %s1289_s20  ;;  %v1534_v8 = vsel %vm304_vm2, %v308_v6, %v309_v7 }
  0x6c   : > { %v458_v60 = vadd.f32 %v454_v59, %v319_v15  ;;  %v332_v10 = vrot.slane %v1534_v8, 1  ;;  %v351_v12 = vrot.slane %v1534_v8, 2  ;;  %v1545_v15 = vsel %vm304_vm2, %v309_v7, 0.0 }
  0x6d   : > { %v370_v18 = vrot.slane %v1534_v8, 3  ;;  %v334_v22 = vrot.slane %v1545_v15, 1  ;;  %v388_v25 = vrot.slane %v1534_v8, 4  ;;  %v353_v30 = vrot.slane %v1545_v15, 2 }
  0x6e   : > { %v333_v13 = vsel %vm325_vm3, %v331_v11, %v332_v10  ;;  %v352_v19 = vsel %vm344_vm4, %v350_v14, %v351_v12  ;;  %v407_v35 = vrot.slane %v1534_v8, 5  ;;  %v372_v39 = vrot.slane %v1545_v15, 3 }
  0x6f   : > { %467 = vrot.lane.b32.xlu0 %v458_v60, %s1289_s20  ;;  %v342_v16 = vadd.f32 %v333_v13, %v1537_v9  ;;  %v371_v26 = vsel %vm363_vm5, %v369_v20, %v370_v18  ;;  %v335_v29 = vsel %vm325_vm3, %v332_v10, %v334_v22  ;;  %v389_v36 = vsel %vm304_vm2, %v387_v27, %v388_v25 }
  0x70   : > { %v343_v34 = vadd.f32 %v335_v29, %v1534_v8  ;;  %v354_v38 = vsel %vm344_vm4, %v351_v12, %v353_v30  ;;  %v426_v42 = vrot.slane %v1534_v8, 6  ;;  %v408_v43 = vsel %vm400_vm6, %v406_v37, %v407_v35 }
  0x71   : > { %v361_v24 = vadd.f32 %v352_v19, %v342_v16  ;;  %v373_v45 = vsel %vm363_vm5, %v370_v18, %v372_v39  ;;  %v390_v46 = vrot.slane %v1545_v15, 4  ;;  %v445_v49 = vrot.slane %v1534_v8, 7 }
  0x72   : > { %v362_v41 = vadd.f32 %v354_v38, %v343_v34  ;;  %v427_v50 = vsel %vm419_vm7, %v425_v44, %v426_v42  ;;  %v409_v53 = vrot.slane %v1545_v15, 5  ;;  %v428_v58 = vrot.slane %v1545_v15, 6 }
  0x73   : > { %v380_v33 = vadd.f32 %v371_v26, %v361_v24  ;;  %v391_v52 = vsel %vm304_vm2, %v388_v25, %v390_v46  ;;  %v446_v56 = vsel %vm438_vm8, %v444_v51, %v445_v49  ;;  %v447_v5 = vrot.slane %v1545_v15, 7 }
  0x74   : > { %v381_v48 = vadd.f32 %v373_v45, %v362_v41  ;;  %v410_v57 = vsel %vm400_vm6, %v407_v35, %v409_v53  ;;  %v429_v63 = vsel %vm419_vm7, %v426_v42, %v428_v58  ;;  %v623_v51 = vrot.slane %v1524_v61, 7 }
  0x75   : > { %v398_v40 = vadd.f32 %v389_v36, %v380_v33  ;;  %v448_v9 = vsel %vm438_vm8, %v445_v49, %v447_v5 }
  0x76   : > { %v399_v55 = vadd.f32 %v391_v52, %v381_v48  ;;  %v624_v52 = vrot.slane %v1527_v62, 7 }
  0x77   : > { %v417_v47 = vadd.f32 %v408_v43, %v398_v40 }
  0x78   : > { %v418_v60 = vadd.f32 %v410_v57, %v399_v55 }
  0x79   : > { %v436_v54 = vadd.f32 %v427_v50, %v417_v47 }
  0x7a   : > { %v437_v7 = vadd.f32 %v429_v63, %v418_v60 }
  0x7b   : > { %v455_v59 = vadd.f32 %v446_v56, %v436_v54 }
  0x7c   : > { %v456_v10 = vadd.f32 %v448_v9, %v437_v7 }
  0x7d   : > { %v459_v6 = vadd.f32 %v455_v59, %v1534_v8 }
  0x7e   : > { %v460_v11 = vadd.f32 %v456_v10, %v1545_v15  ;;  %v630_v10 = vsel %vm438_vm8, %v624_v52, 0.0 }
  0xdd   : > { %v466_v17 = vpop.permute.xlu0 %465 }
  0xde   : > { %v478_v21 = vsel %vm477_vm9, 0.0, %v466_v17 }
  0xdf   : > { %v1554_v23 = vsel %vm482_vm10, %v478_v21, 0.0 }
  0xe0   : > { %507 = vrot.lane.b32.xlu0 %v1554_v23, %s1290_s5  ;;  %491 = vrot.lane.b32.xlu1 %v1554_v23, %s1291_s6 }
  0xe1   : > { %v468_v28 = vpop.permute.xlu0 %467 }
  0xe2   : > { %v479_v31 = vsel %vm477_vm9, 0.0, %v468_v28 }
  0xe3   : > { %v1567_v32 = vsel %vm482_vm10, %v479_v31, 0.0 }
  0xe4   : > { %523 = vrot.lane.b32.xlu0 %v1554_v23, %s1292_s14  ;;  %493 = vrot.lane.b32.xlu1 %v1567_v32, %s1291_s6 }
  0xe8   : > { %539 = vrot.lane.b32.xlu0 %v1554_v23, %s1293_s17  ;;  %509 = vrot.lane.b32.xlu1 %v1567_v32, %s1290_s5 }
  0xec   : > { %555 = vrot.lane.b32.xlu0 %v1554_v23, %s1294_s28  ;;  %525 = vrot.lane.b32.xlu1 %v1567_v32, %s1292_s14 }
  0xf0   : > { %571 = vrot.lane.b32.xlu0 %v1554_v23, %s1295_s24  ;;  %541 = vrot.lane.b32.xlu1 %v1567_v32, %s1293_s17 }
  0xf4   : > { %587 = vrot.lane.b32.xlu0 %v1554_v23, %s1296_s26  ;;  %557 = vrot.lane.b32.xlu1 %v1567_v32, %s1294_s28 }
  0xf8   : > { %603 = vrot.lane.b32.xlu0 %v1554_v23, %s1297_s27  ;;  %573 = vrot.lane.b32.xlu1 %v1567_v32, %s1295_s24 }
  0xfc   : > { %469 = vrot.lane.b32.xlu0 %v459_v6, %s1289_s20  ;;  %589 = vrot.lane.b32.xlu1 %v1567_v32, %s1296_s26  ;;  %v625_v6 = vsel %vm438_vm8, %v623_v51, %v624_v52 }
 0x100   : > { %605 = vrot.lane.b32.xlu1 %v1567_v32, %s1297_s27 }
 0x104   : > { %471 = vrot.lane.b32.xlu1 %v460_v11, %s1289_s20 }
 0x152   : > { %v492_v8 = vpop.permute.xlu1 %491  ;;  %v508_v12 = vpop.permute.xlu0 %507 }
 0x153   : > { %v503_v16 = vadd.f32 %v492_v8, %v1554_v23 }
 0x155   : > { %v519_v19 = vadd.f32 %v508_v12, %v503_v16 }
 0x156   : > { %v524_v13 = vpop.permute.xlu0 %523  ;;  %v494_v14 = vpop.permute.xlu1 %493 }
 0x157   : > { %v535_v22 = vadd.f32 %v524_v13, %v519_v19  ;;  %v504_v15 = vadd.f32 %v494_v14, %v1567_v32  ;;  %v629_v13 = vsel %vm438_vm8, 0.0, %v623_v51 }
 0x15a   : > { %v540_v17 = vpop.permute.xlu0 %539  ;;  %v510_v18 = vpop.permute.xlu1 %509 }
 0x15b   : > { %v551_v25 = vadd.f32 %v540_v17, %v535_v22  ;;  %v520_v31 = vadd.f32 %v510_v18, %v504_v15  ;;  %v634_v18 = vrot.slane %v625_v6, 1 }
 0x15e   : > { %v556_v20 = vpop.permute.xlu0 %555  ;;  %v526_v21 = vpop.permute.xlu1 %525 }
 0x15f   : > { %v567_v27 = vadd.f32 %v556_v20, %v551_v25  ;;  %v536_v34 = vadd.f32 %v526_v21, %v520_v31 }
 0x162   : > { %v572_v24 = vpop.permute.xlu0 %571  ;;  %v542_v26 = vpop.permute.xlu1 %541 }
 0x163   : > { %v583_v29 = vadd.f32 %v572_v24, %v567_v27  ;;  %v552_v37 = vadd.f32 %v542_v26, %v536_v34  ;;  %v636_v27 = vrot.slane %v630_v10, 1 }
 0x166   : > { %v588_v28 = vpop.permute.xlu0 %587  ;;  %v558_v30 = vpop.permute.xlu1 %557 }
 0x167   : > { %v599_v33 = vadd.f32 %v588_v28, %v583_v29  ;;  %v568_v38 = vadd.f32 %v558_v30, %v552_v37 }
 0x16a   : > { %v604_v35 = vpop.permute.xlu0 %603  ;;  %v574_v23 = vpop.permute.xlu1 %573 }
 0x16b   : > { %v1625_v36 = vadd.f32 %v604_v35, %v599_v33  ;;  %v584_v32 = vadd.f32 %v574_v23, %v568_v38  ;;  %v633_v35 = vrot.slane %v629_v13, 1 }
 0x16d   : > { %vm717_vm11 = vcmp.ne.f32.partialorder %v1625_v36, 0.0 }
 0x16e   : > { %v1049_v39 = vsel %vm717_vm11, 1.0, %v1288_v2  ;;  %v590_v40 = vpop.permute.xlu1 %589  ;;  %vm921_vm11 = vcmask 39936  }
 0x16f   : > { %v723_v41 = vsel %vm715_vm12, 0.0, %v1049_v39  ;;  %v600_v42 = vadd.f32 %v590_v40, %v584_v32  ;;  %vm923_vm12 = vcmask 48128  }
 0x170   : > { %v725_v45 = vmul.f32 %v723_v41, %v1524_v61 }
 0x172   : > { %v606_v43 = vpop.permute.xlu1 %605  ;;  %v729_v48 = vrot.slane %v725_v45, 4 }
 0x173   : > { %v1630_v44 = vadd.f32 %v606_v43, %v600_v42  ;;  %v643_v42 = vrot.slane %v625_v6, 2 }
 0x174   : > { %v1640_v53 = vsel %vm304_vm2, 0.0, %v729_v48 }
 0x175   : > { %vm718_vm14 = vcmp.ne.f32.partialorder %v1630_v44, 0.0  ;;  %v739_v9 = vrot.slane %v1640_v53, 1  ;;  %v748_v17 = vrot.slane %v1640_v53, 2  ;;  %v757_v26 = vrot.slane %v1640_v53, 3 }
 0x176   : > { %v1050_v46 = vsel %vm718_vm14, 1.0, %v1288_v2  ;;  %v766_v34 = vrot.slane %v1640_v53, 4  ;;  %v775_v41 = vrot.slane %v1640_v53, 5  ;;  %vm927_vm14 = vcmask 57344  }
 0x177   : > { %v724_v47 = vsel %vm716_vm13, 0.0, %v1050_v46  ;;  %v637_v46 = vsel %vm325_vm3, %v634_v18, %v636_v27  ;;  %vm925_vm13 = vcmask 56320  }
 0x178   : > { %v726_v49 = vmul.f32 %v724_v47, %v1527_v62  ;;  %v645_v47 = vrot.slane %v630_v10, 2 }
 0x17a   : > { %v730_v50 = vrot.slane %v726_v49, 4 }
 0x17c   : > { %v1643_v54 = vsel %vm304_vm2, %v729_v48, %v730_v50  ;;  %v736_v55 = vsel %vm304_vm2, %v730_v50, 0.0  ;;  %v784_v50 = vrot.slane %v1640_v53, 6 }
 0x17d   : > { %v740_v56 = vrot.slane %v1643_v54, 1  ;;  %v742_v57 = vrot.slane %v736_v55, 1  ;;  %v749_v58 = vrot.slane %v1643_v54, 2  ;;  %v751_v59 = vrot.slane %v736_v55, 2 }
 0x17e   : > { %v758_v63 = vrot.slane %v1643_v54, 3  ;;  %v760_v5 = vrot.slane %v736_v55, 3  ;;  %v767_v8 = vrot.slane %v1643_v54, 4  ;;  %v769_v12 = vrot.slane %v736_v55, 4 }
 0x17f   : > { %v743_v60 = vsel %vm325_vm3, %v740_v56, %v742_v57  ;;  %v752_v11 = vsel %vm344_vm4, %v749_v58, %v751_v59  ;;  %v741_v16 = vsel %vm325_vm3, %v739_v9, %v740_v56  ;;  %v776_v20 = vrot.slane %v1643_v54, 5 }
 0x180   : > { %v747_v7 = vadd.f32 %v743_v60, %v1643_v54  ;;  %v761_v19 = vsel %vm363_vm5, %v758_v63, %v760_v5  ;;  %v778_v21 = vrot.slane %v736_v55, 5  ;;  %v746_v22 = vadd.f32 %v741_v16, %v1640_v53 }
 0x181   : > { %v750_v25 = vsel %vm344_vm4, %v748_v17, %v749_v58  ;;  %v770_v15 = vsel %vm304_vm2, %v767_v8, %v769_v12  ;;  %v785_v28 = vrot.slane %v1643_v54, 6  ;;  %v787_v29 = vrot.slane %v736_v55, 6  ;;  %v472_v12 = vpop.permute.xlu1 %471 }
 0x182   : > { %v756_v14 = vadd.f32 %v752_v11, %v747_v7  ;;  %v755_v30 = vadd.f32 %v750_v25, %v746_v22  ;;  %v759_v33 = vsel %vm363_vm5, %v757_v26, %v758_v63  ;;  %v779_v23 = vsel %vm400_vm6, %v776_v20, %v778_v21 }
 0x183   : > { %v794_v37 = vrot.slane %v1643_v54, 7  ;;  %v796_v38 = vrot.slane %v736_v55, 7  ;;  %v768_v32 = vsel %vm304_vm2, %v766_v34, %v767_v8  ;;  %v788_v43 = vsel %vm419_vm7, %v785_v28, %v787_v29  ;;  %v1133_v34 = vpop.eup %1132 }
 0x184   : > { %v765_v24 = vadd.f32 %v761_v19, %v756_v14  ;;  %v764_v39 = vadd.f32 %v759_v33, %v755_v30  ;;  %v777_v49 = vsel %vm400_vm6, %v775_v41, %v776_v20  ;;  %v635_v56 = vsel %vm325_vm3, %v633_v35, %v634_v18  ;;  %v1135_v35 = vpop.eup %1134 }
 0x185   : > { %v797_v51 = vsel %vm438_vm8, %v794_v37, %v796_v38  ;;  %v642_v57 = vrot.slane %v629_v13, 2  ;;  %v786_v59 = vsel %vm419_vm7, %v784_v50, %v785_v28  ;;  %v793_v60 = vrot.slane %v1640_v53, 7  ;;  %v470_v53 = vpop.permute.xlu0 %469 }
 0x186   : > { %v774_v31 = vadd.f32 %v770_v15, %v765_v24  ;;  %v773_v45 = vadd.f32 %v768_v32, %v764_v39  ;;  %v641_v63 = vadd.f32 %v637_v46, %v625_v6  ;;  %v646_v7 = vsel %vm344_vm4, %v643_v42, %v645_v47 }
 0x187   : > { %v795_v10 = vsel %vm438_vm8, %v793_v60, %v794_v37  ;;  %v640_v8 = vadd.f32 %v635_v56, %v629_v13  ;;  %v644_v16 = vsel %vm344_vm4, %v642_v57, %v643_v42  ;;  %v481_v18 = vsel %vm477_vm9, 0.0, %v472_v12 }
 0x188   : > { %v783_v40 = vadd.f32 %v779_v23, %v774_v31  ;;  %v782_v52 = vadd.f32 %v777_v49, %v773_v45  ;;  %v650_v14 = vadd.f32 %v646_v7, %v641_v63  ;;  %v480_v13 = vsel %vm477_vm9, 0.0, %v470_v53 }
 0x189   : > { %v649_v6 = vadd.f32 %v644_v16, %v640_v8  ;;  %v1692_v19 = vsel %vm482_vm10, %v480_v13, 0.0  ;;  %v211_v31 = vsub.f32 1.0, %v1524_v61  ;;  %v212_v33 = vsub.f32 1.0, %v1527_v62 }
 0x18a   : > { %v792_v48 = vadd.f32 %v788_v43, %v783_v40  ;;  %v791_v5 = vadd.f32 %v786_v59, %v782_v52  ;;  %v206_v38 = vmul.f32 0.6931472, %v1133_v34  ;;  %v208_v39 = vmul.f32 0.6931472, %v1135_v35 }
 0x18b   : > { %1136 = vlog2.f32 %v211_v31  ;;  %vm220_vm2 = vcmp.eq.f32.partialorder %v1492_v1, 1.0  ;;  %vm221_vm3 = vcmp.eq.f32.partialorder %v1490_v0, 0.0  ;;  %vm222_vm4 = vcmp.eq.f32.partialorder %v1492_v1, 0.0 }
 0x18c   : > { %v801_v58 = vadd.f32 %v797_v51, %v792_v48  ;;  %v800_v11 = vadd.f32 %v795_v10, %v791_v5  ;;  %1138 = vlog2.f32 %v212_v33  ;;  %v209_v32 = vmax.f32 %v206_v38, -100.0 }
 0x18d   : > { %v210_v41 = vmax.f32 %v208_v39, -100.0  ;;  %vm227_vm5 = vcmask 130048   ;;  %v1043_v57 = vsel %vm219_vm1, 1.0, %v1288_v2  ;;  %v1046_v8 = vsel %vm222_vm4, 1.0, %v1288_v2 }
 0x18e   : > { %v803_v9 = vadd.f32 %v801_v58, %v736_v55  ;;  %v802_v17 = vadd.f32 %v800_v11, %v1643_v54  ;;  %v1688_v55 = vsel %vm482_vm10, %v481_v18, 0.0  ;;  %v223_v43 = vsub.f32 0.0, %v209_v32 }
 0x18f   : > { %v224_v45 = vsub.f32 0.0, %v210_v41  ;;  %v1044_v58 = vsel %vm220_vm2, 1.0, %v1288_v2  ;;  %v262_v5 = vsel %vm227_vm5, %v1043_v57, 0.0  ;;  %v1045_v11 = vsel %vm221_vm3, 1.0, %v1288_v2 }
 0x190   : > { %808 = vrot.lane.b32.xlu1 %v803_v9, %s1289_s20  ;;  %806 = vrot.lane.b32.xlu0 %v802_v17, %s1289_s20  ;;  %v225_v48 = vsel %vm219_vm1, %v223_v43, 0.0  ;;  %v263_v7 = vsel %vm227_vm5, %v1044_v58, 0.0  ;;  %v279_v16 = vsel %vm227_vm5, %v1045_v11, 0.0  ;;  %v280_v17 = vsel %vm227_vm5, %v1046_v8, 0.0  ;;  %s942_s20 = sshll.u32 %s200_s29, 4  ;;  %s1833_s20 = int_to_ptr.vmem [resolvable:$true] %s942_s20 }
 0x191   : > { %v226_v49 = vsel %vm220_vm2, %v224_v45, 0.0  ;;  %v228_v52 = vsel %vm227_vm5, %v225_v48, 0.0  ;;  %v264_v12 = vadd.f32 %v263_v7, %v262_v5  ;;  %v281_v53 = vadd.f32 %v280_v17, %v279_v16 }
 0x192   : > { %v229_v56 = vsel %vm227_vm5, %v226_v49, 0.0  ;;  %vm699_vm6 = vcmp.gt.f32.partialorder %v1630_v44, 0.0  ;;  %vm698_vm7 = vcmp.gt.f32.partialorder %v1625_v36, 0.0  ;;  %vm916_vm8 = vcmask 15360  }
 0x193   : > { %v230_v63 = vadd.f32 %v229_v56, %v228_v52 }
 0x194   : > { %655 = vrot.lane.b32.xlu1 %v650_v14, %s1298_s25  ;;  %653 = vrot.lane.b32.xlu0 %v649_v6, %s1298_s25 }
 0x195   : > { %v1137_v23 = vpop.eup %1136 }
 0x196   : > { %v1139_v37 = vpop.eup %1138  ;;  %v214_v61 = vmul.f32 0.6931472, %v1137_v23 }
 0x197   : > { %v216_v40 = vmul.f32 0.6931472, %v1139_v37 }
 0x198   : > { %497 = vrot.lane.b32.xlu1 %v1688_v55, %s1291_s6  ;;  %495 = vrot.lane.b32.xlu0 %v1692_v19, %s1291_s6  ;;  %v217_v42 = vmax.f32 %v214_v61, -100.0 }
 0x199   : > { %v218_v62 = vmax.f32 %v216_v40, -100.0 }
 0x19a   : > { %v241_v46 = vsub.f32 0.0, %v217_v42 }
 0x19b   : > { %v242_v47 = vsub.f32 0.0, %v218_v62 }
 0x19c   : > { %513 = vrot.lane.b32.xlu1 %v1688_v55, %s1290_s5  ;;  %511 = vrot.lane.b32.xlu0 %v1692_v19, %s1290_s5  ;;  %v243_v50 = vsel %vm221_vm3, %v241_v46, 0.0 }
 0x19d   : > { %v244_v51 = vsel %vm222_vm4, %v242_v47, 0.0  ;;  %v245_v59 = vsel %vm227_vm5, %v243_v50, 0.0 }
 0x19e   : > { %v246_v60 = vsel %vm227_vm5, %v244_v51, 0.0 }
 0x19f   : > { %v247_v10 = vadd.f32 %v246_v60, %v245_v59 }
 0x1a0   : > { %529 = vrot.lane.b32.xlu1 %v1688_v55, %s1292_s14  ;;  %527 = vrot.lane.b32.xlu0 %v1692_v19, %s1292_s14 }
 0x1a4   : > { %545 = vrot.lane.b32.xlu1 %v1688_v55, %s1293_s17  ;;  %543 = vrot.lane.b32.xlu0 %v1692_v19, %s1293_s17 }
 0x1a8   : > { %561 = vrot.lane.b32.xlu1 %v1688_v55, %s1294_s28  ;;  %559 = vrot.lane.b32.xlu0 %v1692_v19, %s1294_s28 }
 0x1ac   : > { %577 = vrot.lane.b32.xlu1 %v1688_v55, %s1295_s24  ;;  %575 = vrot.lane.b32.xlu0 %v1692_v19, %s1295_s24 }
 0x1b0   : > { %593 = vrot.lane.b32.xlu1 %v1688_v55, %s1296_s26  ;;  %591 = vrot.lane.b32.xlu0 %v1692_v19, %s1296_s26 }
 0x1b4   : > { %609 = vrot.lane.b32.xlu1 %v1688_v55, %s1297_s27  ;;  %607 = vrot.lane.b32.xlu0 %v1692_v19, %s1297_s27 }
 0x202   : > { %v809_v54 = vpop.permute.xlu1 %808  ;;  %v807_v22 = vpop.permute.xlu0 %806 }
 0x203   : > { %v813_v20 = vsel %vm477_vm9, 0.0, %v809_v54  ;;  %v812_v24 = vsel %vm477_vm9, 0.0, %v807_v22 }
 0x204   : > { %v1728_v21 = vsel %vm482_vm10, %v813_v20, 0.0  ;;  %v1734_v25 = vsel %vm482_vm10, %v812_v24, 0.0  ;;  %vm918_vm10 = vcmask 23552  }
 0x205   : > { %820 = vrot.lane.b32.xlu1 %v1728_v21, %s1291_s6  ;;  %818 = vrot.lane.b32.xlu0 %v1734_v25, %s1291_s6 }
 0x206   : > { %v656_v26 = vpop.permute.xlu1 %655  ;;  %v654_v15 = vpop.permute.xlu0 %653 }
 0x207   : > { %v661_v27 = vsel %vm659_vm15, 0.0, %v656_v26  ;;  %v660_v29 = vsel %vm659_vm15, 0.0, %v654_v15 }
 0x208   : > { %v1765_v28 = vsel %vm662_vm0, %v661_v27, 0.0  ;;  %v1770_v30 = vsel %vm662_vm0, %v660_v29, 0.0 }
 0x209   : > { %828 = vrot.lane.b32.xlu1 %v1728_v21, %s1290_s5  ;;  %826 = vrot.lane.b32.xlu0 %v1734_v25, %s1290_s5 }
 0x20a   : > { %v498_v9 = vpop.permute.xlu1 %497  ;;  %v496_v14 = vpop.permute.xlu0 %495 }
 0x20b   : > { %v506_v37 = vadd.f32 %v498_v9, %v1688_v55  ;;  %v505_v40 = vadd.f32 %v496_v14, %v1692_v19 }
 0x20d   : > { %836 = vrot.lane.b32.xlu1 %v1728_v21, %s1292_s14  ;;  %834 = vrot.lane.b32.xlu0 %v1734_v25, %s1292_s14  ;;  %s1831_s14 = scalar_lea.hbm %s1877_s2, %s1051_s3 }
 0x20e   : > { %v514_v18 = vpop.permute.xlu1 %513  ;;  %v512_v6 = vpop.permute.xlu0 %511 }
 0x20f   : > { %v522_v61 = vadd.f32 %v514_v18, %v506_v37  ;;  %v521_v62 = vadd.f32 %v512_v6, %v505_v40 }
 0x211   : > { %844 = vrot.lane.b32.xlu1 %v1728_v21, %s1293_s17  ;;  %842 = vrot.lane.b32.xlu0 %v1734_v25, %s1293_s17  ;;  %s1212_s17 = scalar_lea.vmem %s1833_s20, 16 }
 0x212   : > { %v530_v13 = vpop.permute.xlu1 %529  ;;  %v528_v0 = vpop.permute.xlu0 %527  ;;  %p1213_p13 = scmp.ne.s32.totalorder %s1833_s20, %s1212_s17 }
 0x213   : > { %v538_v32 = vadd.f32 %v530_v13, %v522_v61  ;;  %v537_v47 = vadd.f32 %v528_v0, %v521_v62 }
 0x214   : > { %p1214_p12 = pnand %p1213_p13, %p1887_p1 }
 0x215   : > { %852 = vrot.lane.b32.xlu1 %v1728_v21, %s1294_s28  ;;  %850 = vrot.lane.b32.xlu0 %v1734_v25, %s1294_s28  ;;  %s1299_s28 = smov [#allocation7]  }
 0x216   : > { %v546_v54 = vpop.permute.xlu1 %545  ;;  %v544_v20 = vpop.permute.xlu0 %543  ;;  %p1215_p10 = pneg %p1214_p12 }
 0x217   : > { %v554_v45 = vadd.f32 %v546_v54, %v538_v32  ;;  %v553_v55 = vadd.f32 %v544_v20, %v537_v47 }
 0x219   : > { %860 = vrot.lane.b32.xlu1 %v1728_v21, %s1295_s24  ;;  %858 = vrot.lane.b32.xlu0 %v1734_v25, %s1295_s24  ;;  %s1216_s24 = sshll.u32 %s1299_s28, 4  ;;  %s1217_s24 = int_to_ptr.vmem [resolvable:$false] %s1216_s24 }
 0x21a   : > { %v562_v22 = vpop.permute.xlu1 %561  ;;  %v560_v1 = vpop.permute.xlu0 %559  ;;  %p1219_p5 = scmp.lt.s32.totalorder %s1833_s20, %s1217_s24 }
 0x21b   : > { %v570_v49 = vadd.f32 %v562_v22, %v554_v45  ;;  %v569_v19 = vadd.f32 %v560_v1, %v553_v55 }
 0x21d   : > { %868 = vrot.lane.b32.xlu1 %v1728_v21, %s1296_s26  ;;  %866 = vrot.lane.b32.xlu0 %v1734_v25, %s1296_s26  ;;  %s1218_s26 = scalar_lea.vmem %s1217_s24, 32 }
 0x21e   : > { %v578_v2 = vpop.permute.xlu1 %577  ;;  %v576_v24 = vpop.permute.xlu0 %575  ;;  %p1220_p7 = scmp.lt.s32.totalorder %s1218_s26, %s1212_s17 }
 0x21f   : > { %v586_v57 = vadd.f32 %v578_v2, %v570_v49  ;;  %v585_v5 = vadd.f32 %v576_v24, %v569_v19 }
 0x220   : > { %p1221_p9 = por %p1220_p7, %p1219_p5 }
 0x221   : > { %876 = vrot.lane.b32.xlu1 %v1728_v21, %s1297_s27  ;;  %874 = vrot.lane.b32.xlu0 %v1734_v25, %s1297_s27 }
 0x222   : > { %v594_v26 = vpop.permute.xlu1 %593  ;;  %v592_v27 = vpop.permute.xlu0 %591  ;;  %p1222_p11 = pnand %p1221_p9, %p1215_p10 }
 0x223   : > { %v602_v60 = vadd.f32 %v594_v26, %v586_v57  ;;  %v601_v8 = vadd.f32 %v592_v27, %v585_v5 }
 0x225   : > { %669 = vrot.lane.b32.xlu1 %v1765_v28, %s1291_s6  ;;  %667 = vrot.lane.b32.xlu0 %v1770_v30, %s1291_s6 }
 0x226   : > { %v610_v15 = vpop.permute.xlu1 %609  ;;  %v608_v29 = vpop.permute.xlu0 %607 }
 0x227   : > { %v617_v16 = vadd.f32 %v608_v29, %v601_v8 }
 0x229   : > { %677 = vrot.lane.b32.xlu1 %v1765_v28, %s1290_s5  ;;  %675 = vrot.lane.b32.xlu0 %v1770_v30, %s1290_s5  ;;  %v619_v20 = vmul.f32 %v1497_v3, %v617_v16 }
 0x248   : > { %231 = vadd.xlane.f32.xlu0 %v230_v63 }
 0x24c   : > { %265 = vadd.xlane.f32.xlu0 %v264_v12 }
 0x24d   : > { %248 = vadd.xlane.f32.xlu1 %v247_v10  ;;  %v618_v10 = vadd.f32 %v610_v15, %v602_v60  ;;  %v894_v60 = vsub.f32 0.0, %v1497_v3 }
 0x250   : > { %282 = vadd.xlane.f32.xlu0 %v281_v53  ;;  %v620_v53 = vmul.f32 %v1500_v4, %v618_v10 }
 0x277   : > { %v821_v31 = vpop.permute.xlu1 %820  ;;  %v819_v33 = vpop.permute.xlu0 %818 }
 0x278   : > { %v825_v41 = vadd.f32 %v821_v31, %v1728_v21  ;;  %v824_v48 = vadd.f32 %v819_v33, %v1734_v25 }
 0x27b   : > { %v829_v34 = vpop.permute.xlu1 %828  ;;  %v827_v35 = vpop.permute.xlu0 %826 }
 0x27c   : > { %v833_v46 = vadd.f32 %v829_v34, %v825_v41  ;;  %v832_v52 = vadd.f32 %v827_v35, %v824_v48 }
 0x27f   : > { %v837_v23 = vpop.permute.xlu1 %836  ;;  %v835_v38 = vpop.permute.xlu0 %834 }
 0x280   : > { %v841_v50 = vadd.f32 %v837_v23, %v833_v46  ;;  %v840_v59 = vadd.f32 %v835_v38, %v832_v52  ;;  %v895_v52 = vsub.f32 0.0, %v1500_v4 }
 0x283   : > { %v845_v39 = vpop.permute.xlu1 %844  ;;  %v843_v42 = vpop.permute.xlu0 %842 }
 0x284   : > { %v849_v58 = vadd.f32 %v845_v39, %v841_v50  ;;  %v848_v7 = vadd.f32 %v843_v42, %v840_v59 }
 0x287   : > { %v853_v43 = vpop.permute.xlu1 %852  ;;  %v851_v51 = vpop.permute.xlu0 %850 }
 0x288   : > { %v857_v21 = vadd.f32 %v853_v43, %v849_v58  ;;  %v856_v25 = vadd.f32 %v851_v51, %v848_v7 }
 0x28b   : > { %v861_v56 = vpop.permute.xlu1 %860  ;;  %v859_v63 = vpop.permute.xlu0 %858 }
 0x28c   : > { %v865_v11 = vadd.f32 %v861_v56, %v857_v21  ;;  %v864_v17 = vadd.f32 %v859_v63, %v856_v25 }
 0x28f   : > { %v869_v9 = vpop.permute.xlu1 %868  ;;  %v867_v14 = vpop.permute.xlu0 %866 }
 0x290   : > { %v873_v12 = vadd.f32 %v869_v9, %v865_v11  ;;  %v872_v13 = vadd.f32 %v867_v14, %v864_v17 }
 0x293   : > { %v877_v18 = vpop.permute.xlu1 %876  ;;  %v875_v54 = vpop.permute.xlu0 %874 }
 0x294   : > { %v881_v6 = vadd.f32 %v877_v18, %v873_v12  ;;  %v880_v22 = vadd.f32 %v875_v54, %v872_v13 }
 0x296   : > { %v883_v0 = vadd.f32 %v881_v6, %v620_v53  ;;  %v882_v24 = vadd.f32 %v880_v22, %v619_v20 }
 0x297   : > { %v670_v1 = vpop.permute.xlu1 %669  ;;  %v668_v27 = vpop.permute.xlu0 %667 }
 0x298   : > { %v885_v2 = vadd.f32 1e-10, %v883_v0  ;;  %v674_v26 = vadd.f32 %v670_v1, %v1765_v28  ;;  %v884_v15 = vadd.f32 1e-10, %v882_v24  ;;  %v673_v33 = vadd.f32 %v668_v27, %v1770_v30 }
 0x29a   : > { %1140 = vrcp.f32 %v885_v2 }
 0x29b   : > { %v678_v29 = vpop.permute.xlu1 %677  ;;  %1142 = vrcp.f32 %v884_v15  ;;  %v676_v35 = vpop.permute.xlu0 %675 }
 0x29c   : > { %v682_v31 = vadd.f32 %v678_v29, %v674_v26  ;;  %v681_v23 = vadd.f32 %v676_v35, %v673_v33 }
 0x29e   : > { %v685_v34 = vmul.f32 0.11111111, %v682_v31  ;;  %v684_v38 = vmul.f32 0.11111111, %v681_v23 }
 0x2a0   : > { %v687_v37 = vsub.f32 1.0, %v685_v34  ;;  %v686_v61 = vsub.f32 1.0, %v684_v38 }
 0x2a2   : > { %v689_v39 = vmax.f32 %v687_v37, 1e-10  ;;  %v688_v41 = vmax.f32 %v686_v61, 1e-10 }
 0x2a4   : > { %v1141_v40 = vpop.eup %1140  ;;  %v691_v32 = vmin.f32 %v689_v39, 1.0  ;;  %v690_v62 = vmin.f32 %v688_v41, 1.0 }
 0x2a5   : > { %v889_v42 = vmul.f32 %v1141_v40, %v620_v53  ;;  %v1143_v28 = vpop.eup %1142 }
 0x2a6   : > { %1144 = vlog2.f32 %v691_v32  ;;  %v887_v45 = vmul.f32 %v1143_v28, %v619_v20 }
 0x2a7   : > { %v891_v43 = vmax.f32 %v889_v42, 1e-10  ;;  %1146 = vlog2.f32 %v690_v62 }
 0x2a8   : > { %v890_v47 = vmax.f32 %v887_v45, 1e-10 }
 0x2a9   : > { %v893_v46 = vmin.f32 %v891_v43, 1.0 }
 0x2aa   : > { %v892_v30 = vmin.f32 %v890_v47, 1.0 }
 0x2ab   : > { %1148 = vlog2.f32 %v893_v46 }
 0x2ac   : > { %1150 = vlog2.f32 %v892_v30 }
 0x2b0   : > { %v1145_v48 = vpop.eup %1144 }
 0x2b1   : > { %v695_v49 = vmul.f32 0.6931472, %v1145_v48  ;;  %v1147_v50 = vpop.eup %1146 }
 0x2b2   : > { %v693_v55 = vmul.f32 0.6931472, %v1147_v50 }
 0x2b3   : > { %v697_v51 = vsub.f32 0.0, %v695_v49 }
 0x2b4   : > { %v696_v58 = vsub.f32 0.0, %v693_v55 }
 0x2b5   : > { %v1149_v56 = vpop.eup %1148  ;;  %v701_v57 = vsel %vm699_vm6, 0.0, %v697_v51 }
 0x2b6   : > { %v899_v19 = vmul.f32 0.6931472, %v1149_v56  ;;  %v703_v59 = vsel %vm227_vm5, %v701_v57, 0.0  ;;  %v1151_v21 = vpop.eup %1150  ;;  %v700_v63 = vsel %vm698_vm7, 0.0, %v696_v58 }
 0x2b7   : > { %v702_v7 = vsel %vm227_vm5, %v700_v63, 0.0  ;;  %v897_v9 = vmul.f32 0.6931472, %v1151_v21 }
 0x2b8   : > { %v901_v5 = vmul.f32 %v899_v19, %v895_v52  ;;  %v704_v44 = vadd.f32 %v703_v59, %v702_v7 }
 0x2b9   : > { %v900_v10 = vmul.f32 %v897_v9, %v894_v60 }
 0x2ba   : > { %v903_v4 = vsel %vm227_vm5, %v901_v5, 0.0  ;;  %705 = vadd.xlane.f32.xlu1 %v704_v44 }
 0x2bb   : > { %v902_v11 = vsel %vm227_vm5, %v900_v10, 0.0 }
 0x2bc   : > { %v904_v8 = vadd.f32 %v903_v4, %v902_v11 }
 0x2be   : > { %905 = vadd.xlane.f32.xlu0 %v904_v8 }
 0x2d5   : > { %v232_v36 = vpop.xlane.xlu0 %231 }
 0x2d6   : > { %v233_v25 = vrot.slane %v232_v36, 4 }
 0x2d8   : > { %v234_v14 = vadd.f32 %v233_v25, %v232_v36 }
 0x2d9   : > { %v266_v16 = vpop.xlane.xlu0 %265 }
 0x2da   : > { %v249_v12 = vpop.xlane.xlu1 %248  ;;  %v235_v17 = vrot.slane %v234_v14, 2  ;;  %v267_v18 = vrot.slane %v266_v16, 4 }
 0x2db   : > { %v250_v3 = vrot.slane %v249_v12, 4 }
 0x2dc   : > { %v268_v6 = vadd.f32 %v267_v18, %v266_v16  ;;  %v236_v0 = vadd.f32 %v235_v17, %v234_v14 }
 0x2dd   : > { %v251_v53 = vadd.f32 %v250_v3, %v249_v12  ;;  %v283_v54 = vpop.xlane.xlu0 %282 }
 0x2de   : > { %v269_v20 = vrot.slane %v268_v6, 2  ;;  %v284_v22 = vrot.slane %v283_v54, 4  ;;  %v237_v1 = vrot.slane %v236_v0, 1 }
 0x2df   : > { %v252_v13 = vrot.slane %v251_v53, 2 }
 0x2e0   : > { %v285_v24 = vadd.f32 %v284_v22, %v283_v54  ;;  %v238_v26 = vadd.f32 %v237_v1, %v236_v0  ;;  %v270_v15 = vadd.f32 %v269_v20, %v268_v6 }
 0x2e1   : > { %v253_v2 = vadd.f32 %v252_v13, %v251_v53 }
 0x2e2   : > { %v286_v29 = vrot.slane %v285_v24, 2  ;;  %1056 = vpush %v238_v26  ;;  %v271_v33 = vrot.slane %v270_v15, 1 }
 0x2e3   : > { %v254_v27 = vrot.slane %v253_v2, 1 }
 0x2e4   : > { %v272_v34 = vadd.f32 %v271_v33, %v270_v15  ;;  %v287_v35 = vadd.f32 %v286_v29, %v285_v24 }
 0x2e5   : > { %v255_v31 = vadd.f32 %v254_v27, %v253_v2 }
 0x2e6   : > { %v288_v23 = vrot.slane %v287_v35, 1 }
 0x2e7   : > { %1058 = vpush %v255_v31 }
 0x2e8   : > { %1060 = vpush %v272_v34  ;;  %v289_v37 = vadd.f32 %v288_v23, %v287_v35 }
 0x2ea   : > { %1062 = vpush %v289_v37 }
 0x313   : > { %s1057_s7 = spop %1056 }
 0x314   : > { %v240_v48 = vstv %s1057_s7 }
 0x318   : > { %s1059_s8 = spop %1058 }
 0x319   : > { %v257_v49 = vstv %s1059_s8  ;;  %s1061_s16 = spop %1060 }
 0x31a   : > { %v915_v50 = vsel %vm659_vm15, %v240_v48, %v257_v49  ;;  %v274_v51 = vstv %s1061_s16 }
 0x31b   : > { %s1063_s4 = spop %1062  ;;  %v917_v55 = vsel %vm916_vm8, %v915_v50, %v274_v51 }
 0x31c   : > { %v291_v52 = vstv %s1063_s4 }
 0x31d   : > { %v919_v57 = vsel %vm918_vm10, %v917_v55, %v291_v52 }
 0x347   : > { %v706_v38 = vpop.xlane.xlu1 %705 }
 0x348   : > { %v707_v39 = vrot.slane %v706_v38, 4 }
 0x34a   : > { %v708_v61 = vadd.f32 %v707_v39, %v706_v38 }
 0x34b   : > { %v906_v40 = vpop.xlane.xlu0 %905 }
 0x34c   : > { %v709_v32 = vrot.slane %v708_v61, 2  ;;  %v907_v41 = vrot.slane %v906_v40, 4 }
 0x34e   : > { %v710_v42 = vadd.f32 %v709_v32, %v708_v61  ;;  %v908_v28 = vadd.f32 %v907_v41, %v906_v40 }
 0x350   : > { %v909_v62 = vrot.slane %v908_v28, 2  ;;  %v711_v43 = vrot.slane %v710_v42, 1 }
 0x352   : > { %v910_v45 = vadd.f32 %v909_v62, %v908_v28  ;;  %v712_v46 = vadd.f32 %v711_v43, %v710_v42 }
 0x354   : > { %1064 = vpush %v712_v46  ;;  %v911_v47 = vrot.slane %v910_v45, 1 }
 0x356   : > { %v912_v30 = vadd.f32 %v911_v47, %v910_v45 }
 0x358   : > { %1066 = vpush %v912_v30 }
 0x385   : > { %s1065_s19 = spop %1064 }
 0x386   : > { %v714_v56 = vstv %s1065_s19 }
 0x387   : > { %v920_v58 = vsel %vm477_vm9, %v919_v57, %v714_v56 }
 0x389   : > { %s1067_s23 = spop %1066 }
 0x38a   : > { %v914_v19 = vstv %s1067_s23 }
 0x38b   : > { %v922_v59 = vsel %vm921_vm11, %v920_v58, %v914_v19 }
 0x38c   : > { %v924_v60 = vsel %vm923_vm12, %v922_v59, 0.0 }
 0x38d   : > { %v926_v21 = vsel %vm925_vm13, %v924_v60, 0.0 }
 0x38e   : > { %928 = vst.msk [vmem:[%s200_s29] sm:$0x1] %vm927_vm14, %v926_v21 }
 0x38f   : > { %1225 = shalt.err (!%p1222_p11)
}
 0x390   : > { %s1226_s30 = scalar_lea.hbm %s1831_s14, 16  ;;  %s1230_s7 = scalar_lea.hbm %s1877_s2, 32 }
 0x391   : > { %p1227_p3 = scmp.ne.s32.totalorder %s1831_s14, %s1226_s30  ;;  %p1231_p2 = scmp.lt.u32.totalorder %s1831_s14, %s1877_s2 }
 0x392   : > { %p1232_p4 = scmp.lt.u32.totalorder %s1230_s7, %s1226_s30  ;;  %p1234_p13 = scmp.lt.u32.totalorder %s1226_s30, %s1831_s14 }
 0x393   : > { %p1228_p8 = pnand %p1227_p3, %p1887_p1 }
 0x394   : > { %p1233_p6 = por %p1232_p4, %p1231_p2 }
 0x395   : > { %p1229_p0 = pneg %p1228_p8 }
 0x396   : > { %p1235_p12 = por %p1234_p13, %p1233_p6 }
 0x398   : > { %p1236_p10 = pnand %p1235_p12, %p1229_p0 }
 0x39a   : > { %1239 = shalt.err (!%p1236_p10)
}
 0x39b   : > { %1072 = dma.vmem_to_hbm [thread:$0]  (%p1887_p1), %s1833_s20, 16, %s1831_s14, %s930_s13  }
 0x39c PF: > { %s954_s4 = sand.u32 1, %s1270_s9   ;;  %p1888_p5 = scmp.ne.s32.totalorder %s1883_s22, 0 }
 0x39d   : > { %p1889_p7 = scmp.ge.s32.totalorder %s1282_s12, 2  ;;  %s955_s19 = scalar_lea.sflag [#allocation4], %s954_s4 }
 0x39f   : > { %p1082_p9 = pnand %p1889_p7, %p1888_p5 }
 0x3a1   : > { %1265 = dma.done.wait (!%p1082_p9), %s955_s19, 16  }
 0x3a2   : > { %1267 = vsyncadd (!%p1082_p9), %s955_s19, 4294967280  ;;  %p18_p11 = scmp.ge.s32.totalorder %s1340_s15, 4   ;;  %s1890_s9 = smov %s1274_s10 }
 0x3a3   : > { %s1891_s10 = smov %s1278_s11  ;;  %s1892_s11 = smov %s1352_s18 }
 0x3a4   : > { %s1893_s12 = smov %s1340_s15  ;;  %20 = sbr.rel (!%p18_p11) target bundleno = 7 (0x7), region = 86 }
 0x3ab   :  { %959 = vsyncpa [#allocation3], 1 }
 0x3ac   :  { %961 = vsyncpa [#allocation3 + $0x1], 1 }
 0x3ad   :  { %962 = vsyncpa [#allocation6], 1 }
 0x3ae   :  { %964 = vsyncpa [#allocation6 + $0x1], 1 }
 0x3af   :  { %965 = vsyncpa [#allocation4], 1 }
 0x3b0   :  { %967 = vsyncpa [#allocation4 + $0x1], 1 }

</bundles_post_ra>
